<compile_context>
chip_gen: v7x
topology: tpu7x:2x2x1
jax: 0.10.0
libtpu: 0.0.40
codegen_flags: <defaults>
</compile_context>

<pallas_src>
import functools
from typing import NamedTuple

import numpy as np
import jax
import jax.numpy as jnp
from jax import lax
from jax.experimental import pallas as pl
from jax.experimental.pallas import tpu as pltpu


class DQNConfig(NamedTuple):
    c_in: int
    h: int
    w: int
    k1: int
    s1: int
    c1: int
    h1: int
    w1: int
    k2: int
    s2: int
    c2: int
    h2: int
    w2: int
    k3: int
    s3: int
    c3: int
    h3: int
    w3: int
    fc_dim: int
    n_out: int
    n_pad: int
    bias_w: int


def make_config(input_size, output_size):
    c_in, h, w = input_size

    def osz(n, k, s):
        return (n - k) // s + 1

    k1, s1, c1 = 8, 4, 32
    k2, s2, c2 = 4, 2, 64
    k3, s3, c3 = 3, 1, 64
    h1, w1 = osz(h, k1, s1), osz(w, k1, s1)
    h2, w2 = osz(h1, k2, s2), osz(w1, k2, s2)
    h3, w3 = osz(h2, k3, s3), osz(w2, k3, s3)
    assert min(h1, w1, h2, w2, h3, w3) >= 1, "input too small for the conv stack"
    fc_dim = 512
    n_pad = max(128, ((output_size + 127) // 128) * 128)
    bias_w = max(fc_dim, n_pad)
    return DQNConfig(c_in=c_in, h=h, w=w,
                     k1=k1, s1=s1, c1=c1, h1=h1, w1=w1,
                     k2=k2, s2=s2, c2=c2, h2=h2, w2=w2,
                     k3=k3, s3=s3, c3=c3, h3=h3, w3=w3,
                     fc_dim=fc_dim, n_out=output_size, n_pad=n_pad, bias_w=bias_w)


# ------------------------------------------------------------------ params ---

def init_params(key, cfg):
    """Deterministic synthetic params in PyTorch layout (uniform, fan-in bounds)."""
    conv_out = cfg.c3 * cfg.h3 * cfg.w3
    ks = jax.random.split(key, 10)

    def u(k, shape, fan_in):
        bound = 1.0 / np.sqrt(fan_in)
        return jax.random.uniform(k, shape, jnp.float32, -bound, bound)

    f1 = cfg.c_in * cfg.k1 * cfg.k1
    f2 = cfg.c1 * cfg.k2 * cfg.k2
    f3 = cfg.c2 * cfg.k3 * cfg.k3
    return dict(
        w1=u(ks[0], (cfg.c1, cfg.c_in, cfg.k1, cfg.k1), f1), b1=u(ks[1], (cfg.c1,), f1),
        w2=u(ks[2], (cfg.c2, cfg.c1, cfg.k2, cfg.k2), f2),   b2=u(ks[3], (cfg.c2,), f2),
        w3=u(ks[4], (cfg.c3, cfg.c2, cfg.k3, cfg.k3), f3),   b3=u(ks[5], (cfg.c3,), f3),
        fw1=u(ks[6], (cfg.fc_dim, conv_out), conv_out),      fb1=u(ks[7], (cfg.fc_dim,), conv_out),
        fw2=u(ks[8], (cfg.n_out, cfg.fc_dim), cfg.fc_dim),   fb2=u(ks[9], (cfg.n_out,), cfg.fc_dim),
    )


def _gather_matrix(h, w, k, stride):
    """0/1 matrix G of shape (k*k*Ho*Wo, h*w), tap-major rows: row t*Ho*Wo + o
    (t = kh*k + kw, o = ho*Wo + wo) selects input pixel (ho*stride+kh, wo*stride+kw).
    G @ act(h*w, C) produces per-tap contiguous row blocks (exact gather)."""
    ho = (h - k) // stride + 1
    wo = (w - k) // stride + 1
    g = np.zeros((k * k * ho * wo, h * w), dtype=np.float32)
    r = 0
    for kh in range(k):
        for kw in range(k):
            for i in range(ho):
                for j in range(wo):
                    g[r, (i * stride + kh) * w + (j * stride + kw)] = 1.0
                    r += 1
    return jnp.asarray(g)


def _stack_taps(wconv):
    """(Cout, Cin, k, k) torch conv weight -> (k*k*Cin, Cout), tap-major:
    rows [t*Cin:(t+1)*Cin] equal w[:, :, kh, kw].T for tap t = kh*k + kw."""
    cout, cin, k, _ = wconv.shape
    return jnp.transpose(wconv, (2, 3, 1, 0)).reshape(k * k * cin, cout)


def pack_params(tp, cfg):
    """One-time packing of PyTorch-layout params into the kernel layout (bf16
    matmul operands, f32 biases packed into one buffer)."""
    bf16 = jnp.bfloat16
    sp3 = cfg.h3 * cfg.w3
    # fc1: fold torch's channel-major flatten (index = c*sp3 + o) into the
    # weight so the kernel consumes (spatial, channel)-ordered activations
    # (flatten column = o*c3 + c).
    fw1t = tp["fw1"].T                                                # (c3*sp3, fc) row = c*sp3 + o
    fw1s = jnp.transpose(fw1t.reshape(cfg.c3, sp3, cfg.fc_dim),
                         (1, 0, 2)).reshape(sp3 * cfg.c3, cfg.fc_dim)  # row = o*c3 + c
    fw2p = jnp.zeros((cfg.fc_dim, cfg.n_pad), jnp.float32).at[:, :cfg.n_out].set(tp["fw2"].T)
    # All biases in one lane-padded (8, bias_w) f32 buffer (one DMA descriptor).
    bias = jnp.zeros((8, cfg.bias_w), jnp.float32)
    bias = bias.at[0, :cfg.c1].set(tp["b1"])
    bias = bias.at[1, :cfg.c2].set(tp["b2"])
    bias = bias.at[2, :cfg.c3].set(tp["b3"])
    bias = bias.at[3, :cfg.fc_dim].set(tp["fb1"])
    bias = bias.at[4, :cfg.n_out].set(tp["fb2"])
    return dict(
        w1t=tp["w1"].reshape(cfg.c1, cfg.c_in * cfg.k1 * cfg.k1).T.astype(bf16),   # (Cin*k1*k1, c1)
        g2=_gather_matrix(cfg.h1, cfg.w1, cfg.k2, cfg.s2).astype(bf16),            # (t2*sp2, sp1)
        w2s=_stack_taps(tp["w2"]).astype(bf16),                                    # (t2*c1, c2)
        g3=_gather_matrix(cfg.h2, cfg.w2, cfg.k3, cfg.s3).astype(bf16),            # (t3*sp3, sp2)
        w3s=_stack_taps(tp["w3"]).astype(bf16),                                    # (t3*c2, c3)
        bias=bias,                                                                  # (8, bias_w) f32
        fw1s=fw1s.astype(bf16),                                                    # (sp3*c3, fc_dim)
        fw2p=fw2p.astype(bf16),                                                    # (fc_dim, n_pad)
    )


# ------------------------------------------------------------------ kernel ---

def _dqn_kernel(p1_ref, w1t_ref, g2_ref, w2s_ref, g3_ref, w3s_ref, bias_ref,
                fw1_hbm, fw2_hbm, o_ref, fw1_vmem, fw2_vmem, sem, *, cfg):
    """Whole DQN forward.  7 dependent GEMMs; fc weights prefetched from HBM
    behind the conv stack via manual async copies."""
    f32, bf16 = jnp.float32, jnp.bfloat16
    sp2 = cfg.h2 * cfg.w2
    sp3 = cfg.h3 * cfg.w3
    t2 = cfg.k2 * cfg.k2
    t3 = cfg.k3 * cfg.k3

    # Kick off the fc-weight DMAs so they overlap with the conv stack.
    cp_fw1 = pltpu.make_async_copy(fw1_hbm, fw1_vmem, sem.at[0])
    cp_fw2 = pltpu.make_async_copy(fw2_hbm, fw2_vmem, sem.at[1])
    cp_fw1.start()
    cp_fw2.start()

    b1 = bias_ref[0:1, :cfg.c1]
    b2 = bias_ref[1:2, :cfg.c2]
    b3 = bias_ref[2:3, :cfg.c3]
    fb1 = bias_ref[3:4, :cfg.fc_dim]
    fb2 = bias_ref[4:5, :cfg.n_pad]

    # conv1 + ReLU: single GEMM over the host-prepared patch matrix.
    h1 = jnp.dot(p1_ref[...], w1t_ref[...], preferred_element_type=f32)
    h1 = jnp.maximum(h1 + b1, 0.0).astype(bf16)                       # (sp1, c1)

    # conv2 + ReLU: one gather GEMM + static-slice/concat relayout + one GEMM.
    # g2h rows are tap-major (t*sp2 + o); concatenating the per-tap row blocks
    # along lanes yields the (sp2, t2*c1) im2col matrix with column t*c1 + c,
    # matching the tap-stacked w2s rows.  The gather is exact, so the bf16
    # cast of its f32 accumulator loses nothing.
    g2h = jnp.dot(g2_ref[...], h1, preferred_element_type=f32).astype(bf16)   # (t2*sp2, c1)
    im2 = jnp.concatenate([g2h[t * sp2:(t + 1) * sp2, :] for t in range(t2)],
                          axis=1)                                              # (sp2, t2*c1)
    h2 = jnp.dot(im2, w2s_ref[...], preferred_element_type=f32)
    h2 = jnp.maximum(h2 + b2, 0.0).astype(bf16)                       # (sp2, c2)

    # conv3 + ReLU: same single-GEMM structure.
    g3h = jnp.dot(g3_ref[...], h2, preferred_element_type=f32).astype(bf16)   # (t3*sp3, c2)
    im3 = jnp.concatenate([g3h[t * sp3:(t + 1) * sp3, :] for t in range(t3)],
                          axis=1)                                              # (sp3, t3*c2)
    h3 = jnp.dot(im3, w3s_ref[...], preferred_element_type=f32)
    h3 = jnp.maximum(h3 + b3, 0.0).astype(bf16)                       # (sp3, c3)

    # fc1 + ReLU: torch flatten order (c-major) is baked into fw1s, so the
    # flatten is a lane-axis concat of the h3 rows (column = o*c3 + c).
    flat = jnp.concatenate([h3[o:o + 1, :] for o in range(sp3)], axis=1)      # (1, sp3*c3)
    cp_fw1.wait()
    v = jnp.dot(flat, fw1_vmem[...], preferred_element_type=f32)
    v = jnp.maximum(v + fb1, 0.0).astype(bf16)                        # (1, fc_dim)

    # fc2: lane-padded to n_pad (multiple of 128) -> unmasked output store.
    cp_fw2.wait()
    o_ref[...] = jnp.dot(v, fw2_vmem[...], preferred_element_type=f32) + fb2


# ----------------------------------------------------------------- wrapper ---

def _im2col_conv1(x, cfg):
    """x: (C, H, W) -> (Ho*Wo, C*k*k) patches, built directly row-major with
    columns ordered (ci, kh, kw) to match w1.reshape(c1, -1).T — no final
    transpose.  Pure layout glue, fused by XLA under jit."""
    k, s, ho, wo = cfg.k1, cfg.s1, cfg.h1, cfg.w1
    cols = []
    for ci in range(cfg.c_in):
        for kh in range(k):
            for kw in range(k):
                cols.append(x[ci, kh:kh + s * (ho - 1) + 1:s,
                                  kw:kw + s * (wo - 1) + 1:s].reshape(ho * wo))
    return jnp.stack(cols, axis=-1)                                   # (ho*wo, C*k*k)


@functools.partial(jax.jit, static_argnames=("cfg",))
def dqn_forward(params, x, *, cfg):
    """x: (1, C, H, W) float32 -> (output_size,) float32.
    Matches torch `self.fc(self.conv(x).flatten())` (batch must be 1)."""
    assert x.shape == (1, cfg.c_in, cfg.h, cfg.w), f"expected batch-1 input, got {x.shape}"
    p1 = _im2col_conv1(x[0], cfg).astype(jnp.bfloat16)
    kernel = functools.partial(_dqn_kernel, cfg=cfg)
    vmem = pltpu.MemorySpace.VMEM
    out = pl.pallas_call(
        kernel,
        out_shape=jax.ShapeDtypeStruct((1, cfg.n_pad), jnp.float32),
        in_specs=[pl.BlockSpec(memory_space=vmem)] * 7
                 + [pl.BlockSpec(memory_space=pl.ANY)] * 2,
        out_specs=pl.BlockSpec(memory_space=vmem),
        scratch_shapes=[
            pltpu.VMEM((cfg.h3 * cfg.w3 * cfg.c3, cfg.fc_dim), jnp.bfloat16),
            pltpu.VMEM((cfg.fc_dim, cfg.n_pad), jnp.bfloat16),
            pltpu.SemaphoreType.DMA((2,)),
        ],
    )(p1, params["w1t"], params["g2"], params["w2s"], params["g3"],
      params["w3s"], params["bias"], params["fw1s"], params["fw2p"])
    return out[0, :cfg.n_out]


# --------------------------------------------------------------- reference ---

def reference_forward(tp, x):
    """Pure-JAX (XLA) reference with PyTorch-layout params, high precision."""
    hp = lax.Precision.HIGHEST

    def conv(h, w, b, stride):
        y = lax.conv_general_dilated(
            h, w, window_strides=(stride, stride), padding="VALID",
            dimension_numbers=("NCHW", "OIHW", "NCHW"), precision=hp)
        return jax.nn.relu(y + b.reshape(1, -1, 1, 1))

    h = conv(x, tp["w1"], tp["b1"], 4)
    h = conv(h, tp["w2"], tp["b2"], 2)
    h = conv(h, tp["w3"], tp["b3"], 1)
    flat = h.reshape(-1)
    v = jax.nn.relu(jnp.dot(tp["fw1"], flat, precision=hp) + tp["fb1"])
    return jnp.dot(tp["fw2"], v, precision=hp) + tp["fb2"]


if __name__ == "__main__":
    # conv1 (k=8,s=4): 44 -> 10 ; conv2 (k=4,s=2): 10 -> 4 ; conv3 (k=3,s=1): 4 -> 2
    # conv_out_size = 64*2*2 = 256
    input_size = (4, 44, 44)
    output_size = 12

    cfg = make_config(input_size, output_size)
    key = jax.random.PRNGKey(0)
    kp, kx = jax.random.split(key)
    torch_params = init_params(kp, cfg)          # PyTorch-layout params
    params = pack_params(torch_params, cfg)      # one-time packing for the kernel

    x = jax.random.normal(kx, (1,) + input_size, dtype=jnp.float32)

    out = jax.block_until_ready(dqn_forward(params, x, cfg=cfg))
    assert out.shape == (output_size,), out.shape
    assert out.dtype == jnp.float32

    ref = jax.block_until_ready(reference_forward(torch_params, x))
    err = float(jnp.max(jnp.abs(out - ref)))
    assert err < 5e-2, f"Pallas vs reference mismatch: max abs err = {err}"

    print("KERNEL_OK")
</pallas_src>

<mosaic_0001>
module attributes {stable_mosaic.version = 11 : i64} {
  func.func @_dqn_kernel(%arg0: memref<100x256xbf16, #tpu.memory_space<vmem>>, %arg1: memref<256x32xbf16, #tpu.memory_space<vmem>>, %arg2: memref<256x100xbf16, #tpu.memory_space<vmem>>, %arg3: memref<512x64xbf16, #tpu.memory_space<vmem>>, %arg4: memref<36x16xbf16, #tpu.memory_space<vmem>>, %arg5: memref<576x64xbf16, #tpu.memory_space<vmem>>, %arg6: memref<8x512xf32, #tpu.memory_space<vmem>>, %arg7: memref<256x512xbf16, #tpu.memory_space<any>>, %arg8: memref<512x128xbf16, #tpu.memory_space<any>>, %arg9: memref<1x128xf32, #tpu.memory_space<vmem>>, %arg10: memref<256x512xbf16, #tpu.memory_space<vmem>>, %arg11: memref<512x128xbf16, #tpu.memory_space<vmem>>, %arg12: memref<2x!tpu.dma_semaphore, #tpu.memory_space<semaphore_mem>>) attributes {dimension_semantics = [], scalar_prefetch = 0 : i64, scratch_operands = 3 : i64, tpu.core_type = #tpu.core_type<tc>} {
    %c0_i32 = arith.constant 0 : i32
    %0 = tpu.memref_slice %arg12[%c0_i32] : memref<2x!tpu.dma_semaphore, #tpu.memory_space<semaphore_mem>> -> memref<1x!tpu.dma_semaphore, #tpu.memory_space<semaphore_mem>>
    %1 = tpu.memref_squeeze %0 : memref<1x!tpu.dma_semaphore, #tpu.memory_space<semaphore_mem>> -> memref<!tpu.dma_semaphore, #tpu.memory_space<semaphore_mem>>
    tpu.enqueue_dma source(%arg7 : memref<256x512xbf16, #tpu.memory_space<any>>) target(%arg10 : memref<256x512xbf16, #tpu.memory_space<vmem>>) target_semaphore(%1 : memref<!tpu.dma_semaphore, #tpu.memory_space<semaphore_mem>>)
    %c1_i32 = arith.constant 1 : i32
    %2 = tpu.memref_slice %arg12[%c1_i32] : memref<2x!tpu.dma_semaphore, #tpu.memory_space<semaphore_mem>> -> memref<1x!tpu.dma_semaphore, #tpu.memory_space<semaphore_mem>>
    %3 = tpu.memref_squeeze %2 : memref<1x!tpu.dma_semaphore, #tpu.memory_space<semaphore_mem>> -> memref<!tpu.dma_semaphore, #tpu.memory_space<semaphore_mem>>
    tpu.enqueue_dma source(%arg8 : memref<512x128xbf16, #tpu.memory_space<any>>) target(%arg11 : memref<512x128xbf16, #tpu.memory_space<vmem>>) target_semaphore(%3 : memref<!tpu.dma_semaphore, #tpu.memory_space<semaphore_mem>>)
    %c0 = arith.constant 0 : index
    %c0_0 = arith.constant 0 : index
    %4 = vector.load %arg6[%c0, %c0_0] : memref<8x512xf32, #tpu.memory_space<vmem>>, vector<1x32xf32>
    %c1 = arith.constant 1 : index
    %c0_1 = arith.constant 0 : index
    %5 = vector.load %arg6[%c1, %c0_1] : memref<8x512xf32, #tpu.memory_space<vmem>>, vector<1x64xf32>
    %c2 = arith.constant 2 : index
    %c0_2 = arith.constant 0 : index
    %6 = vector.load %arg6[%c2, %c0_2] : memref<8x512xf32, #tpu.memory_space<vmem>>, vector<1x64xf32>
    %c3 = arith.constant 3 : index
    %c0_3 = arith.constant 0 : index
    %7 = vector.load %arg6[%c3, %c0_3] : memref<8x512xf32, #tpu.memory_space<vmem>>, vector<1x512xf32>
    %c4 = arith.constant 4 : index
    %c0_4 = arith.constant 0 : index
    %8 = vector.load %arg6[%c4, %c0_4] : memref<8x512xf32, #tpu.memory_space<vmem>>, vector<1x128xf32>
    %c0_5 = arith.constant 0 : index
    %c0_6 = arith.constant 0 : index
    %9 = vector.load %arg0[%c0_5, %c0_6] : memref<100x256xbf16, #tpu.memory_space<vmem>>, vector<100x256xbf16>
    %c0_7 = arith.constant 0 : index
    %c0_8 = arith.constant 0 : index
    %10 = vector.load %arg1[%c0_7, %c0_8] : memref<256x32xbf16, #tpu.memory_space<vmem>>, vector<256x32xbf16>
    %cst = arith.constant dense<0.000000e+00> : vector<100x32xf32>
    %11 = tpu.matmul %9, %10, %cst {dimension_numbers = #tpu.dot_dimension_numbers<[1], [0], [0], [1], [0, 0, 1, 1], [], []>} : vector<100x256xbf16>, vector<256x32xbf16>, vector<100x32xf32> -> vector<100x32xf32>
    %12 = vector.broadcast %4 : vector<1x32xf32> to vector<100x32xf32>
    %13 = arith.addf %11, %12 : vector<100x32xf32>
    %cst_9 = arith.constant 0.000000e+00 : f32
    %14 = vector.broadcast %cst_9 : f32 to vector<100x32xf32>
    %15 = arith.maximumf %13, %14 : vector<100x32xf32>
    %16 = arith.truncf %15 : vector<100x32xf32> to vector<100x32xbf16>
    %c0_10 = arith.constant 0 : index
    %c0_11 = arith.constant 0 : index
    %17 = vector.load %arg2[%c0_10, %c0_11] : memref<256x100xbf16, #tpu.memory_space<vmem>>, vector<256x100xbf16>
    %cst_12 = arith.constant dense<0.000000e+00> : vector<256x32xf32>
    %18 = tpu.matmul %17, %16, %cst_12 {dimension_numbers = #tpu.dot_dimension_numbers<[1], [0], [0], [1], [0, 0, 1, 1], [], []>} : vector<256x100xbf16>, vector<100x32xbf16>, vector<256x32xf32> -> vector<256x32xf32>
    %19 = arith.truncf %18 : vector<256x32xf32> to vector<256x32xbf16>
    %20 = vector.extract_strided_slice %19 {offsets = [0, 0], sizes = [16, 32], strides = [1, 1]} : vector<256x32xbf16> to vector<16x32xbf16>
    %21 = vector.extract_strided_slice %19 {offsets = [16, 0], sizes = [16, 32], strides = [1, 1]} : vector<256x32xbf16> to vector<16x32xbf16>
    %22 = vector.extract_strided_slice %19 {offsets = [32, 0], sizes = [16, 32], strides = [1, 1]} : vector<256x32xbf16> to vector<16x32xbf16>
    %23 = vector.extract_strided_slice %19 {offsets = [48, 0], sizes = [16, 32], strides = [1, 1]} : vector<256x32xbf16> to vector<16x32xbf16>
    %24 = vector.extract_strided_slice %19 {offsets = [64, 0], sizes = [16, 32], strides = [1, 1]} : vector<256x32xbf16> to vector<16x32xbf16>
    %25 = vector.extract_strided_slice %19 {offsets = [80, 0], sizes = [16, 32], strides = [1, 1]} : vector<256x32xbf16> to vector<16x32xbf16>
    %26 = vector.extract_strided_slice %19 {offsets = [96, 0], sizes = [16, 32], strides = [1, 1]} : vector<256x32xbf16> to vector<16x32xbf16>
    %27 = vector.extract_strided_slice %19 {offsets = [112, 0], sizes = [16, 32], strides = [1, 1]} : vector<256x32xbf16> to vector<16x32xbf16>
    %28 = vector.extract_strided_slice %19 {offsets = [128, 0], sizes = [16, 32], strides = [1, 1]} : vector<256x32xbf16> to vector<16x32xbf16>
    %29 = vector.extract_strided_slice %19 {offsets = [144, 0], sizes = [16, 32], strides = [1, 1]} : vector<256x32xbf16> to vector<16x32xbf16>
    %30 = vector.extract_strided_slice %19 {offsets = [160, 0], sizes = [16, 32], strides = [1, 1]} : vector<256x32xbf16> to vector<16x32xbf16>
    %31 = vector.extract_strided_slice %19 {offsets = [176, 0], sizes = [16, 32], strides = [1, 1]} : vector<256x32xbf16> to vector<16x32xbf16>
    %32 = vector.extract_strided_slice %19 {offsets = [192, 0], sizes = [16, 32], strides = [1, 1]} : vector<256x32xbf16> to vector<16x32xbf16>
    %33 = vector.extract_strided_slice %19 {offsets = [208, 0], sizes = [16, 32], strides = [1, 1]} : vector<256x32xbf16> to vector<16x32xbf16>
    %34 = vector.extract_strided_slice %19 {offsets = [224, 0], sizes = [16, 32], strides = [1, 1]} : vector<256x32xbf16> to vector<16x32xbf16>
    %35 = vector.extract_strided_slice %19 {offsets = [240, 0], sizes = [16, 32], strides = [1, 1]} : vector<256x32xbf16> to vector<16x32xbf16>
    %36 = tpu.concatenate %20, %21, %22, %23, %24, %25, %26, %27, %28, %29, %30, %31, %32, %33, %34, %35 in 1 : vector<16x32xbf16>, vector<16x32xbf16>, vector<16x32xbf16>, vector<16x32xbf16>, vector<16x32xbf16>, vector<16x32xbf16>, vector<16x32xbf16>, vector<16x32xbf16>, vector<16x32xbf16>, vector<16x32xbf16>, vector<16x32xbf16>, vector<16x32xbf16>, vector<16x32xbf16>, vector<16x32xbf16>, vector<16x32xbf16>, vector<16x32xbf16> -> vector<16x512xbf16>
    %c0_13 = arith.constant 0 : index
    %c0_14 = arith.constant 0 : index
    %37 = vector.load %arg3[%c0_13, %c0_14] : memref<512x64xbf16, #tpu.memory_space<vmem>>, vector<512x64xbf16>
    %cst_15 = arith.constant dense<0.000000e+00> : vector<16x64xf32>
    %38 = tpu.matmul %36, %37, %cst_15 {dimension_numbers = #tpu.dot_dimension_numbers<[1], [0], [0], [1], [0, 0, 1, 1], [], []>} : vector<16x512xbf16>, vector<512x64xbf16>, vector<16x64xf32> -> vector<16x64xf32>
    %39 = vector.broadcast %5 : vector<1x64xf32> to vector<16x64xf32>
    %40 = arith.addf %38, %39 : vector<16x64xf32>
    %cst_16 = arith.constant 0.000000e+00 : f32
    %41 = vector.broadcast %cst_16 : f32 to vector<16x64xf32>
    %42 = arith.maximumf %40, %41 : vector<16x64xf32>
    %43 = arith.truncf %42 : vector<16x64xf32> to vector<16x64xbf16>
    %c0_17 = arith.constant 0 : index
    %c0_18 = arith.constant 0 : index
    %44 = vector.load %arg4[%c0_17, %c0_18] : memref<36x16xbf16, #tpu.memory_space<vmem>>, vector<36x16xbf16>
    %cst_19 = arith.constant dense<0.000000e+00> : vector<36x64xf32>
    %45 = tpu.matmul %44, %43, %cst_19 {dimension_numbers = #tpu.dot_dimension_numbers<[1], [0], [0], [1], [0, 0, 1, 1], [], []>} : vector<36x16xbf16>, vector<16x64xbf16>, vector<36x64xf32> -> vector<36x64xf32>
    %46 = arith.truncf %45 : vector<36x64xf32> to vector<36x64xbf16>
    %47 = vector.extract_strided_slice %46 {offsets = [0, 0], sizes = [4, 64], strides = [1, 1]} : vector<36x64xbf16> to vector<4x64xbf16>
    %48 = vector.extract_strided_slice %46 {offsets = [4, 0], sizes = [4, 64], strides = [1, 1]} : vector<36x64xbf16> to vector<4x64xbf16>
    %49 = vector.extract_strided_slice %46 {offsets = [8, 0], sizes = [4, 64], strides = [1, 1]} : vector<36x64xbf16> to vector<4x64xbf16>
    %50 = vector.extract_strided_slice %46 {offsets = [12, 0], sizes = [4, 64], strides = [1, 1]} : vector<36x64xbf16> to vector<4x64xbf16>
    %51 = vector.extract_strided_slice %46 {offsets = [16, 0], sizes = [4, 64], strides = [1, 1]} : vector<36x64xbf16> to vector<4x64xbf16>
    %52 = vector.extract_strided_slice %46 {offsets = [20, 0], sizes = [4, 64], strides = [1, 1]} : vector<36x64xbf16> to vector<4x64xbf16>
    %53 = vector.extract_strided_slice %46 {offsets = [24, 0], sizes = [4, 64], strides = [1, 1]} : vector<36x64xbf16> to vector<4x64xbf16>
    %54 = vector.extract_strided_slice %46 {offsets = [28, 0], sizes = [4, 64], strides = [1, 1]} : vector<36x64xbf16> to vector<4x64xbf16>
    %55 = vector.extract_strided_slice %46 {offsets = [32, 0], sizes = [4, 64], strides = [1, 1]} : vector<36x64xbf16> to vector<4x64xbf16>
    %56 = tpu.concatenate %47, %48, %49, %50, %51, %52, %53, %54, %55 in 1 : vector<4x64xbf16>, vector<4x64xbf16>, vector<4x64xbf16>, vector<4x64xbf16>, vector<4x64xbf16>, vector<4x64xbf16>, vector<4x64xbf16>, vector<4x64xbf16>, vector<4x64xbf16> -> vector<4x576xbf16>
    %c0_20 = arith.constant 0 : index
    %c0_21 = arith.constant 0 : index
    %57 = vector.load %arg5[%c0_20, %c0_21] : memref<576x64xbf16, #tpu.memory_space<vmem>>, vector<576x64xbf16>
    %cst_22 = arith.constant dense<0.000000e+00> : vector<4x64xf32>
    %58 = tpu.matmul %56, %57, %cst_22 {dimension_numbers = #tpu.dot_dimension_numbers<[1], [0], [0], [1], [0, 0, 1, 1], [], []>} : vector<4x576xbf16>, vector<576x64xbf16>, vector<4x64xf32> -> vector<4x64xf32>
    %59 = vector.broadcast %6 : vector<1x64xf32> to vector<4x64xf32>
    %60 = arith.addf %58, %59 : vector<4x64xf32>
    %cst_23 = arith.constant 0.000000e+00 : f32
    %61 = vector.broadcast %cst_23 : f32 to vector<4x64xf32>
    %62 = arith.maximumf %60, %61 : vector<4x64xf32>
    %63 = arith.truncf %62 : vector<4x64xf32> to vector<4x64xbf16>
    %64 = vector.extract_strided_slice %63 {offsets = [0, 0], sizes = [1, 64], strides = [1, 1]} : vector<4x64xbf16> to vector<1x64xbf16>
    %65 = vector.extract_strided_slice %63 {offsets = [1, 0], sizes = [1, 64], strides = [1, 1]} : vector<4x64xbf16> to vector<1x64xbf16>
    %66 = vector.extract_strided_slice %63 {offsets = [2, 0], sizes = [1, 64], strides = [1, 1]} : vector<4x64xbf16> to vector<1x64xbf16>
    %67 = vector.extract_strided_slice %63 {offsets = [3, 0], sizes = [1, 64], strides = [1, 1]} : vector<4x64xbf16> to vector<1x64xbf16>
    %68 = tpu.concatenate %64, %65, %66, %67 in 1 : vector<1x64xbf16>, vector<1x64xbf16>, vector<1x64xbf16>, vector<1x64xbf16> -> vector<1x256xbf16>
    %c0_i32_24 = arith.constant 0 : i32
    %69 = tpu.memref_slice %arg12[%c0_i32_24] : memref<2x!tpu.dma_semaphore, #tpu.memory_space<semaphore_mem>> -> memref<1x!tpu.dma_semaphore, #tpu.memory_space<semaphore_mem>>
    %70 = tpu.memref_squeeze %69 : memref<1x!tpu.dma_semaphore, #tpu.memory_space<semaphore_mem>> -> memref<!tpu.dma_semaphore, #tpu.memory_space<semaphore_mem>>
    tpu.wait_dma2 semaphore(%70 : memref<!tpu.dma_semaphore, #tpu.memory_space<semaphore_mem>>) src(%arg7 : memref<256x512xbf16, #tpu.memory_space<any>>) dst(%arg10 : memref<256x512xbf16, #tpu.memory_space<vmem>>)
    %c0_25 = arith.constant 0 : index
    %c0_26 = arith.constant 0 : index
    %71 = vector.load %arg10[%c0_25, %c0_26] : memref<256x512xbf16, #tpu.memory_space<vmem>>, vector<256x512xbf16>
    %cst_27 = arith.constant dense<0.000000e+00> : vector<1x512xf32>
    %72 = tpu.matmul %68, %71, %cst_27 {dimension_numbers = #tpu.dot_dimension_numbers<[1], [0], [0], [1], [0, 0, 1, 1], [], []>} : vector<1x256xbf16>, vector<256x512xbf16>, vector<1x512xf32> -> vector<1x512xf32>
    %73 = arith.addf %72, %7 : vector<1x512xf32>
    %cst_28 = arith.constant 0.000000e+00 : f32
    %74 = vector.broadcast %cst_28 : f32 to vector<1x512xf32>
    %75 = arith.maximumf %73, %74 : vector<1x512xf32>
    %76 = arith.truncf %75 : vector<1x512xf32> to vector<1x512xbf16>
    %c1_i32_29 = arith.constant 1 : i32
    %77 = tpu.memref_slice %arg12[%c1_i32_29] : memref<2x!tpu.dma_semaphore, #tpu.memory_space<semaphore_mem>> -> memref<1x!tpu.dma_semaphore, #tpu.memory_space<semaphore_mem>>
    %78 = tpu.memref_squeeze %77 : memref<1x!tpu.dma_semaphore, #tpu.memory_space<semaphore_mem>> -> memref<!tpu.dma_semaphore, #tpu.memory_space<semaphore_mem>>
    tpu.wait_dma2 semaphore(%78 : memref<!tpu.dma_semaphore, #tpu.memory_space<semaphore_mem>>) src(%arg8 : memref<512x128xbf16, #tpu.memory_space<any>>) dst(%arg11 : memref<512x128xbf16, #tpu.memory_space<vmem>>)
    %c0_30 = arith.constant 0 : index
    %c0_31 = arith.constant 0 : index
    %79 = vector.load %arg11[%c0_30, %c0_31] : memref<512x128xbf16, #tpu.memory_space<vmem>>, vector<512x128xbf16>
    %cst_32 = arith.constant dense<0.000000e+00> : vector<1x128xf32>
    %80 = tpu.matmul %76, %79, %cst_32 {dimension_numbers = #tpu.dot_dimension_numbers<[1], [0], [0], [1], [0, 0, 1, 1], [], []>} : vector<1x512xbf16>, vector<512x128xbf16>, vector<1x128xf32> -> vector<1x128xf32>
    %81 = arith.addf %80, %8 : vector<1x128xf32>
    %c0_33 = arith.constant 0 : index
    %c0_34 = arith.constant 0 : index
    %82 = vector.load %arg9[%c0_33, %c0_34] : memref<1x128xf32, #tpu.memory_space<vmem>>, vector<1x128xf32>
    tpu.vector_store %arg9[%c0_33, %c0_34], %81 {strides = array<i32>} : memref<1x128xf32, #tpu.memory_space<vmem>>, vector<1x128xf32>,
    return
  }
}

</mosaic_0001>

<bundles_post_ra>
// kernel: squeeze.256
= control target key start
LH: loop header
LB: loop body
LE: loop exit
PB: predicated region body
PF: predicated region fallthrough
CT: control target
= control target key end

     0   :  { %vm34_vm0 = vcmask 7168   ;;  %s54_s8 = smov 3  ;;  %s369_s9 = smov 126   ;;  %v378_v52 = vmov 0.0   ;;  %s452_s0 = inlined_call_operand.vmem [shape: bf16[10,10], index: 0, kind: input, shape index: {}]   ;;  %s453_s1 = inlined_call_operand.vmem [shape: bf16[100,1], index: 1, kind: output, shape index: {}]  }
   0x1   :  { %v321_v0 = vld [vmem:[%s452_s0] sm:$0xff]   ;;  %s72_s0 = smov 3  ;;  %s370_s10 = smov 127  }
   0x2   :  { %v322_v1 = vunpack.c.l.bf16 %v321_v0  ;;  %v323_v2 = vunpack.c.h.bf16 %v321_v0  ;;  %s90_s11 = smov 3  ;;  %s108_s12 = smov 3 }
   0x3   :  { %s371_s13 = smov 125   ;;  %s126_s14 = smov 3 }
   0x4   :  { %19 = vst [vmem:[#allocation1 + $0x8] sm:$0xff] %v323_v2  ;;  %32 = vst [vmem:[#allocation1] sm:$0xff] %v322_v1  ;;  %s372_s15 = smov 124   ;;  %s144_s16 = smov 3 }
   0x5   :  { %35 = vst.msk [vmem:[#allocation0] ss:$10 sm:$0xff] %vm34_vm0, %v322_v1   ;;  %s373_s17 = smov 123   ;;  %s162_s18 = smov 3 }
   0x6   :  { %s374_s19 = smov 122   ;;  %s180_s20 = smov 3 }
   0x7   :  { %s375_s21 = smov 121   ;;  %s198_s22 = smov 3 }
   0x8   :  { %s376_s23 = smov 120   ;;  %s377_s24 = smov 119  }
   0xb   :  { %v61_v3 = vld.sshfl [vmem:[#allocation1] sm:$0xff pattern:$0x25814703]  }
   0xc   :  { %v41_v4 = vld.sshfl [vmem:[#allocation1] sm:$0xff pattern:$0x92581470]   ;;  %62 = vrot.lane.b32.xlu1 %v61_v3, %s369_s9 }
   0xd   :  { %42 = vrot.lane.b32.xlu0 %v41_v4, %s370_s10  ;;  %v37_v5 = vld [vmem:[#allocation1 + $0x8] sm:$0x3]   ;;  %v55_v7 = vld [vmem:[#allocation1 + $0x6] ss:$-3 sm:%s54_s8]   ;;  %v145_v12 = vld [vmem:[#allocation1 + $0x5] ss:$-3 sm:%s144_s16]  }
   0xe   :  { %v73_v6 = vld [vmem:[#allocation1 + $0x9] ss:$-3 sm:%s72_s0]   ;;  %40 = vst.msk [vmem:[#allocation0 + $0x50] ss:$10 sm:$0x3] %vm34_vm0, %v37_v5  }
   0xf   :  { %v91_v8 = vld [vmem:[#allocation1 + $0x9] ss:$-3 sm:%s90_s11]   ;;  %v163_v14 = vld [vmem:[#allocation1 + $0x5] ss:$-3 sm:%s162_s18]  }
  0x10   :  { %74 = vrot.lane.b32.xlu1 %v73_v6, %s369_s9  ;;  %v109_v9 = vld [vmem:[#allocation1 + $0x2] ss:$7 sm:%s108_s12]  }
  0x11   :  { %56 = vrot.lane.b32.xlu0 %v55_v7, %s370_s10  ;;  %v97_v10 = vld.sshfl [vmem:[#allocation1] sm:$0xff pattern:$0x58147036]  }
  0x12   :  { %v127_v11 = vld [vmem:[#allocation1 + $0x2] ss:$7 sm:%s126_s14]  }
  0x13   :  { %v133_v13 = vld.sshfl [vmem:[#allocation1] sm:$0xff pattern:$0x81470369]   ;;  %v181_v15 = vld [vmem:[#allocation1 + $0x5] ss:$-3 sm:%s180_s20]  }
  0x14   :  { %92 = vrot.lane.b32.xlu1 %v91_v8, %s371_s13  ;;  %v199_v16 = vld [vmem:[#allocation1 + $0x5] ss:$-3 sm:%s198_s22]  }
  0x15   :  { %80 = vrot.lane.b32.xlu0 %v61_v3, %s371_s13 }
  0x18   :  { %110 = vrot.lane.b32.xlu1 %v109_v9, %s372_s15 }
  0x19   :  { %98 = vrot.lane.b32.xlu0 %v97_v10, %s372_s15 }
  0x1c   :  { %128 = vrot.lane.b32.xlu1 %v127_v11, %s373_s17 }
  0x1d   :  { %116 = vrot.lane.b32.xlu0 %v97_v10, %s373_s17 }
  0x20   :  { %146 = vrot.lane.b32.xlu1 %v145_v12, %s374_s19 }
  0x21   :  { %134 = vrot.lane.b32.xlu0 %v133_v13, %s374_s19 }
  0x24   :  { %164 = vrot.lane.b32.xlu1 %v163_v14, %s375_s21 }
  0x25   :  { %152 = vrot.lane.b32.xlu0 %v133_v13, %s375_s21 }
  0x28   :  { %182 = vrot.lane.b32.xlu1 %v181_v15, %s376_s23 }
  0x29   :  { %170 = vrot.lane.b32.xlu0 %v133_v13, %s376_s23 }
  0x2c   :  { %200 = vrot.lane.b32.xlu1 %v199_v16, %s377_s24 }
  0x2d   :  { %188 = vrot.lane.b32.xlu0 %v133_v13, %s377_s24 }
  0x7e   :  { %v63_v17 = vpop.permute.xlu1 %62  }
  0x7f   :  { %v43_v18 = vpop.permute.xlu0 %42   ;;  %66 = vst.msk [vmem:[#allocation0 + $0x20] ss:$-30 sm:$0x3] %vm34_vm0, %v63_v17   ;;  %68 = vst.msk [vmem:[#allocation0 + $0x84] ss:$-30 sm:$0x1c] %vm34_vm0, %v63_v17  }
  0x80   :  { %70 = vst.msk [vmem:[#allocation0 + $0xe8] ss:$-30 sm:$0xe0] %vm34_vm0, %v63_v17   ;;  %46 = vst.msk [vmem:[#allocation0 + $0x1] ss:$70 sm:$0x3] %vm34_vm0, %v43_v18  }
  0x81   :  { %48 = vst.msk [vmem:[#allocation0 + $0x65] ss:$-30 sm:$0xc] %vm34_vm0, %v43_v18   ;;  %50 = vst.msk [vmem:[#allocation0 + $0xc9] ss:$-30 sm:$0x70] %vm34_vm0, %v43_v18  }
  0x82   :  { %52 = vst.msk [vmem:[#allocation0 + $0x54] sm:$0x80] %vm34_vm0, %v43_v18   ;;  %v75_v19 = vpop.permute.xlu1 %74  }
  0x83   :  { %v57_v20 = vpop.permute.xlu0 %56   ;;  %78 = vst.msk [vmem:[#allocation0 + $0x5c] ss:$-30 sm:$0x3] %vm34_vm0, %v75_v19  }
  0x84   :  { %60 = vst.msk [vmem:[#allocation0 + $0x3d] ss:$-30 sm:$0x3] %vm34_vm0, %v57_v20  }
  0x86   :  { %v93_v21 = vpop.permute.xlu1 %92  }
  0x87   :  { %v81_v22 = vpop.permute.xlu0 %80   ;;  %96 = vst.msk [vmem:[#allocation0 + $0x5d] ss:$-30 sm:$0x3] %vm34_vm0, %v93_v21  }
  0x88   :  { %84 = vst.msk [vmem:[#allocation0 + $0x21] ss:$-30 sm:$0x3] %vm34_vm0, %v81_v22   ;;  %86 = vst.msk [vmem:[#allocation0 + $0x85] ss:$-30 sm:$0x1c] %vm34_vm0, %v81_v22  }
  0x89   :  { %88 = vst.msk [vmem:[#allocation0 + $0xe9] ss:$-30 sm:$0xe0] %vm34_vm0, %v81_v22  }
  0x8a   :  { %v111_v23 = vpop.permute.xlu1 %110  }
  0x8b   :  { %v99_v24 = vpop.permute.xlu0 %98   ;;  %114 = vst.msk [vmem:[#allocation0 + $0x18] ss:$70 sm:$0x3] %vm34_vm0, %v111_v23  }
  0x8c   :  { %102 = vst.msk [vmem:[#allocation0 + $0x40] ss:$-30 sm:$0x7] %vm34_vm0, %v99_v24   ;;  %104 = vst.msk [vmem:[#allocation0 + $0xa4] ss:$-30 sm:$0x38] %vm34_vm0, %v99_v24  }
  0x8d   :  { %106 = vst.msk [vmem:[#allocation0 + $0x108] ss:$-30 sm:$0xc0] %vm34_vm0, %v99_v24  }
  0x8e   :  { %v129_v25 = vpop.permute.xlu1 %128  }
  0x8f   :  { %v117_v26 = vpop.permute.xlu0 %116   ;;  %132 = vst.msk [vmem:[#allocation0 + $0x19] ss:$70 sm:$0x3] %vm34_vm0, %v129_v25  }
  0x90   :  { %120 = vst.msk [vmem:[#allocation0 + $0x41] ss:$-30 sm:$0x7] %vm34_vm0, %v117_v26   ;;  %122 = vst.msk [vmem:[#allocation0 + $0xa5] ss:$-30 sm:$0x38] %vm34_vm0, %v117_v26  }
  0x91   :  { %124 = vst.msk [vmem:[#allocation0 + $0x109] ss:$-30 sm:$0xc0] %vm34_vm0, %v117_v26  }
  0x92   :  { %v147_v27 = vpop.permute.xlu1 %146  }
  0x93   :  { %v135_v28 = vpop.permute.xlu0 %134   ;;  %150 = vst.msk [vmem:[#allocation0 + $0x38] ss:$-30 sm:$0x3] %vm34_vm0, %v147_v27  }
  0x94   :  { %138 = vst.msk [vmem:[#allocation0 + $0x60] ss:$-30 sm:$0xf] %vm34_vm0, %v135_v28   ;;  %140 = vst.msk [vmem:[#allocation0 + $0xc4] ss:$-30 sm:$0x70] %vm34_vm0, %v135_v28  }
  0x95   :  { %142 = vst.msk [vmem:[#allocation0 + $0x4f] sm:$0x80] %vm34_vm0, %v135_v28  }
  0x96   :  { %v165_v29 = vpop.permute.xlu1 %164  }
  0x97   :  { %v153_v30 = vpop.permute.xlu0 %152   ;;  %168 = vst.msk [vmem:[#allocation0 + $0x39] ss:$-30 sm:$0x3] %vm34_vm0, %v165_v29  }
  0x98   :  { %156 = vst.msk [vmem:[#allocation0 + $0x61] ss:$-30 sm:$0xf] %vm34_vm0, %v153_v30   ;;  %158 = vst.msk [vmem:[#allocation0 + $0xc5] ss:$-30 sm:$0x70] %vm34_vm0, %v153_v30  }
  0x99   :  { %160 = vst.msk [vmem:[#allocation0 + $0x50] sm:$0x80] %vm34_vm0, %v153_v30  }
  0x9a   :  { %v183_v31 = vpop.permute.xlu1 %182  }
  0x9b   :  { %v171_v32 = vpop.permute.xlu0 %170   ;;  %186 = vst.msk [vmem:[#allocation0 + $0x3a] ss:$-30 sm:$0x3] %vm34_vm0, %v183_v31  }
  0x9c   :  { %174 = vst.msk [vmem:[#allocation0 + $0x62] ss:$-30 sm:$0xf] %vm34_vm0, %v171_v32   ;;  %176 = vst.msk [vmem:[#allocation0 + $0xc6] ss:$-30 sm:$0x70] %vm34_vm0, %v171_v32  }
  0x9d   :  { %178 = vst.msk [vmem:[#allocation0 + $0x51] sm:$0x80] %vm34_vm0, %v171_v32  }
  0x9e   :  { %v201_v33 = vpop.permute.xlu1 %200  }
  0x9f   :  { %v189_v34 = vpop.permute.xlu0 %188   ;;  %204 = vst.msk [vmem:[#allocation0 + $0x3b] ss:$-30 sm:$0x3] %vm34_vm0, %v201_v33   ;;  %v209_v35 = vld [vmem:[#allocation0] sm:$0xff]  ;;  %v241_v36 = vld [vmem:[#allocation0 + $0x28] sm:$0xff] }
  0xa0   :  { %192 = vst.msk [vmem:[#allocation0 + $0x63] ss:$-30 sm:$0xf] %vm34_vm0, %v189_v34   ;;  %194 = vst.msk [vmem:[#allocation0 + $0xc7] ss:$-30 sm:$0x70] %vm34_vm0, %v189_v34  }
  0xa1   :  { %196 = vst.msk [vmem:[#allocation0 + $0x52] sm:$0x80] %vm34_vm0, %v189_v34   ;;  %v276_v50 = vld [vmem:[#allocation0 + $0x50] sm:$0xff] }
  0xa6   :  { %v227_v37 = vld [vmem:[#allocation0 + $0x18] sm:$0xff] }
  0xa7   :  { %v255_v38 = vld [vmem:[#allocation0 + $0x38] sm:$0xff]  ;;  %v214_v39 = vld [vmem:[#allocation0 + $0x8] sm:$0xff]  ;;  %v220_v41 = vld [vmem:[#allocation0 + $0x10] sm:$0xff] }
  0xa8   :  { %v327_v40 = vpack.c.bf16 %v214_v39, %v209_v35  ;;  %v234_v42 = vld [vmem:[#allocation0 + $0x20] sm:$0xff]  ;;  %v248_v43 = vld [vmem:[#allocation0 + $0x30] sm:$0xff]  ;;  %v269_v46 = vld [vmem:[#allocation0 + $0x48] sm:$0xff]  ;;  %v332_v48 = vpack.c.bf16 %v227_v37, %v220_v41 }
  0xa9   :  { %v337_v44 = vpack.c.bf16 %v241_v36, %v234_v42  ;;  %v262_v45 = vld [vmem:[#allocation0 + $0x40] sm:$0xff]  ;;  %v342_v49 = vpack.c.bf16 %v255_v38, %v248_v43  ;;  %v283_v54 = vld [vmem:[#allocation0 + $0x58] sm:$0xff] }
  0xaa   :  { %v290_v47 = vld [vmem:[#allocation0 + $0x60] sm:$0xff]  ;;  %328 = vst [vmem:[%s453_s1] sm:$0xff] %v327_v40   ;;  %v347_v51 = vpack.c.bf16 %v269_v46, %v262_v45  ;;  %354 = vst [vmem:[%s453_s1 + $0x8] sm:$0xff] %v332_v48   ;;  %v352_v55 = vpack.c.bf16 %v283_v54, %v276_v50 }
  0xab   :  { %v291_v53 = vpack.c.bf16 %v378_v52, %v290_v47  ;;  %355 = vst [vmem:[%s453_s1 + $0x10] sm:$0xff] %v337_v44   ;;  %356 = vst [vmem:[%s453_s1 + $0x18] sm:$0xff] %v342_v49  }
  0xac   :  { %357 = vst [vmem:[%s453_s1 + $0x20] sm:$0xff] %v347_v51   ;;  %358 = vst [vmem:[%s453_s1 + $0x28] sm:$0xff] %v352_v55  }
  0xad   :  { %319 = vst [vmem:[%s453_s1 + $0x30] sm:$0xf] %v291_v53 }

// kernel: dqn_forward.1
= control target key start
LH: loop header
LB: loop body
LE: loop exit
PB: predicated region body
PF: predicated region fallthrough
CT: control target
= control target key end

     0   :  { %s4288_s0 = inlined_call_operand.vmem [shape: bf16[100,256], index: 0, kind: input, shape index: {}]   ;;  %s4289_s1 = inlined_call_operand.vmem [shape: bf16[256,32], index: 1, kind: input, shape index: {}]   ;;  %s4290_s2 = inlined_call_operand.vmem [shape: bf16[256,100], index: 2, kind: input, shape index: {}]   ;;  %s4291_s3 = inlined_call_operand.vmem [shape: bf16[512,64], index: 3, kind: input, shape index: {}]   ;;  %s4292_s4 = inlined_call_operand.vmem [shape: bf16[36,16], index: 4, kind: input, shape index: {}]   ;;  %s4293_s5 = inlined_call_operand.vmem [shape: bf16[576,64], index: 5, kind: input, shape index: {}]   ;;  %s4294_s6 = inlined_call_operand.vmem [shape: f32[8,512], index: 6, kind: input, shape index: {}]   ;;  %s4295_s7 = inlined_call_operand.vmem [shape: bf16[256,512], index: 7, kind: input, shape index: {}]   ;;  %s4296_s8 = inlined_call_operand.vmem [shape: bf16[512,128], index: 8, kind: input, shape index: {}]   ;;  %s4297_s9 = inlined_call_operand.vmem [shape: f32[1,128], index: 9, kind: output, shape index: {}]  }
   0x1   :  { %v46_v0 = vld [vmem:[%s4295_s7] sm:$0xf]  ;;  %v48_v1 = vld [vmem:[%s4295_s7 + $0x10] sm:$0xf]  ;;  %v50_v2 = vld [vmem:[%s4295_s7 + $0x4] sm:$0xf] }
   0x2   :  { %47 = vst [vmem:[#allocation2] sm:$0xf] %v46_v0  ;;  %49 = vst [vmem:[#allocation2 + $0x4] sm:$0xf] %v48_v1  ;;  %v52_v3 = vld [vmem:[%s4295_s7 + $0x14] sm:$0xf] }
   0x3   :  { %51 = vst [vmem:[#allocation2 + $0x8] sm:$0xf] %v50_v2  ;;  %v54_v4 = vld [vmem:[%s4295_s7 + $0x8] sm:$0xf]  ;;  %v56_v5 = vld [vmem:[%s4295_s7 + $0x18] sm:$0xf] }
   0x4   :  { %53 = vst [vmem:[#allocation2 + $0xc] sm:$0xf] %v52_v3  ;;  %55 = vst [vmem:[#allocation2 + $0x10] sm:$0xf] %v54_v4  ;;  %v58_v6 = vld [vmem:[%s4295_s7 + $0xc] sm:$0xf] }
   0x5   :  { %57 = vst [vmem:[#allocation2 + $0x14] sm:$0xf] %v56_v5  ;;  %v60_v7 = vld [vmem:[%s4295_s7 + $0x1c] sm:$0xff]   ;;  %v64_v8 = vld [vmem:[%s4295_s7 + $0x30] sm:$0xf] }
   0x6   :  { %59 = vst [vmem:[#allocation2 + $0x18] sm:$0xf] %v58_v6  ;;  %61 = vst [vmem:[#allocation2 + $0x1c] sm:$0xff] %v60_v7   ;;  %v66_v9 = vld [vmem:[%s4295_s7 + $0x24] sm:$0xf]  ;;  %v76_v14 = vld [vmem:[%s4295_s7 + $0x3c] sm:$0xff]  }
   0x7   :  { %65 = vst [vmem:[#allocation2 + $0x24] sm:$0xf] %v64_v8  ;;  %v68_v10 = vld [vmem:[%s4295_s7 + $0x34] sm:$0xf]  ;;  %v70_v11 = vld [vmem:[%s4295_s7 + $0x28] sm:$0xf] }
   0x8   :  { %67 = vst [vmem:[#allocation2 + $0x28] sm:$0xf] %v66_v9  ;;  %69 = vst [vmem:[#allocation2 + $0x2c] sm:$0xf] %v68_v10  ;;  %v72_v12 = vld [vmem:[%s4295_s7 + $0x38] sm:$0xf] }
   0x9   :  { %71 = vst [vmem:[#allocation2 + $0x30] sm:$0xf] %v70_v11  ;;  %v74_v13 = vld [vmem:[%s4295_s7 + $0x2c] sm:$0xf]  ;;  %73 = vst [vmem:[#allocation2 + $0x34] sm:$0xf] %v72_v12 }
   0xa   :  { %75 = vst [vmem:[#allocation2 + $0x38] sm:$0xf] %v74_v13  ;;  %77 = vst [vmem:[#allocation2 + $0x3c] sm:$0xff] %v76_v14   ;;  %v80_v15 = vld [vmem:[%s4295_s7 + $0x50] sm:$0xf]  ;;  %v92_v21 = vld [vmem:[%s4295_s7 + $0x5c] sm:$0xff]  }
   0xb   :  { %v82_v16 = vld [vmem:[%s4295_s7 + $0x44] sm:$0xf]  ;;  %v84_v17 = vld [vmem:[%s4295_s7 + $0x54] sm:$0xf]  ;;  %81 = vst [vmem:[#allocation2 + $0x44] sm:$0xf] %v80_v15 }
   0xc   :  { %83 = vst [vmem:[#allocation2 + $0x48] sm:$0xf] %v82_v16  ;;  %85 = vst [vmem:[#allocation2 + $0x4c] sm:$0xf] %v84_v17  ;;  %v86_v18 = vld [vmem:[%s4295_s7 + $0x48] sm:$0xf] }
   0xd   :  { %v88_v19 = vld [vmem:[%s4295_s7 + $0x58] sm:$0xf]  ;;  %v90_v20 = vld [vmem:[%s4295_s7 + $0x4c] sm:$0xf]  ;;  %87 = vst [vmem:[#allocation2 + $0x50] sm:$0xf] %v86_v18 }
   0xe   :  { %89 = vst [vmem:[#allocation2 + $0x54] sm:$0xf] %v88_v19  ;;  %91 = vst [vmem:[#allocation2 + $0x58] sm:$0xf] %v90_v20  ;;  %v96_v22 = vld [vmem:[%s4295_s7 + $0x70] sm:$0xf] }
   0xf   :  { %v98_v23 = vld [vmem:[%s4295_s7 + $0x64] sm:$0xf]  ;;  %93 = vst [vmem:[#allocation2 + $0x5c] sm:$0xff] %v92_v21   ;;  %97 = vst [vmem:[#allocation2 + $0x64] sm:$0xf] %v96_v22  ;;  %v108_v28 = vld [vmem:[%s4295_s7 + $0x7c] sm:$0xff]  }
  0x10   :  { %99 = vst [vmem:[#allocation2 + $0x68] sm:$0xf] %v98_v23  ;;  %v100_v24 = vld [vmem:[%s4295_s7 + $0x74] sm:$0xf]  ;;  %v102_v25 = vld [vmem:[%s4295_s7 + $0x68] sm:$0xf] }
  0x11   :  { %v104_v26 = vld [vmem:[%s4295_s7 + $0x78] sm:$0xf]  ;;  %101 = vst [vmem:[#allocation2 + $0x6c] sm:$0xf] %v100_v24  ;;  %103 = vst [vmem:[#allocation2 + $0x70] sm:$0xf] %v102_v25 }
  0x12   :  { %105 = vst [vmem:[#allocation2 + $0x74] sm:$0xf] %v104_v26  ;;  %v106_v27 = vld [vmem:[%s4295_s7 + $0x6c] sm:$0xf]  ;;  %v112_v29 = vld [vmem:[%s4295_s7 + $0x90] sm:$0xf] }
  0x13   :  { %107 = vst [vmem:[#allocation2 + $0x78] sm:$0xf] %v106_v27  ;;  %109 = vst [vmem:[#allocation2 + $0x7c] sm:$0xff] %v108_v28   ;;  %v114_v30 = vld [vmem:[%s4295_s7 + $0x84] sm:$0xf]  ;;  %v124_v35 = vld [vmem:[%s4295_s7 + $0x9c] sm:$0xff]  }
  0x14   :  { %113 = vst [vmem:[#allocation2 + $0x84] sm:$0xf] %v112_v29  ;;  %v116_v31 = vld [vmem:[%s4295_s7 + $0x94] sm:$0xf]  ;;  %v118_v32 = vld [vmem:[%s4295_s7 + $0x88] sm:$0xf] }
  0x15   :  { %115 = vst [vmem:[#allocation2 + $0x88] sm:$0xf] %v114_v30  ;;  %117 = vst [vmem:[#allocation2 + $0x8c] sm:$0xf] %v116_v31  ;;  %v120_v33 = vld [vmem:[%s4295_s7 + $0x98] sm:$0xf] }
  0x16   :  { %119 = vst [vmem:[#allocation2 + $0x90] sm:$0xf] %v118_v32  ;;  %v122_v34 = vld [vmem:[%s4295_s7 + $0x8c] sm:$0xf]  ;;  %121 = vst [vmem:[#allocation2 + $0x94] sm:$0xf] %v120_v33 }
  0x17   :  { %123 = vst [vmem:[#allocation2 + $0x98] sm:$0xf] %v122_v34  ;;  %125 = vst [vmem:[#allocation2 + $0x9c] sm:$0xff] %v124_v35   ;;  %v128_v36 = vld [vmem:[%s4295_s7 + $0xb0] sm:$0xf]  ;;  %v140_v42 = vld [vmem:[%s4295_s7 + $0xbc] sm:$0xff]  }
  0x18   :  { %v130_v37 = vld [vmem:[%s4295_s7 + $0xa4] sm:$0xf]  ;;  %v132_v38 = vld [vmem:[%s4295_s7 + $0xb4] sm:$0xf]  ;;  %129 = vst [vmem:[#allocation2 + $0xa4] sm:$0xf] %v128_v36 }
  0x19   :  { %131 = vst [vmem:[#allocation2 + $0xa8] sm:$0xf] %v130_v37  ;;  %133 = vst [vmem:[#allocation2 + $0xac] sm:$0xf] %v132_v38  ;;  %v134_v39 = vld [vmem:[%s4295_s7 + $0xa8] sm:$0xf] }
  0x1a   :  { %v136_v40 = vld [vmem:[%s4295_s7 + $0xb8] sm:$0xf]  ;;  %v138_v41 = vld [vmem:[%s4295_s7 + $0xac] sm:$0xf]  ;;  %135 = vst [vmem:[#allocation2 + $0xb0] sm:$0xf] %v134_v39 }
  0x1b   :  { %137 = vst [vmem:[#allocation2 + $0xb4] sm:$0xf] %v136_v40  ;;  %139 = vst [vmem:[#allocation2 + $0xb8] sm:$0xf] %v138_v41  ;;  %v144_v43 = vld [vmem:[%s4295_s7 + $0xd0] sm:$0xf] }
  0x1c   :  { %v146_v44 = vld [vmem:[%s4295_s7 + $0xc4] sm:$0xf]  ;;  %141 = vst [vmem:[#allocation2 + $0xbc] sm:$0xff] %v140_v42   ;;  %145 = vst [vmem:[#allocation2 + $0xc4] sm:$0xf] %v144_v43  ;;  %v156_v49 = vld [vmem:[%s4295_s7 + $0xdc] sm:$0xff]  }
  0x1d   :  { %147 = vst [vmem:[#allocation2 + $0xc8] sm:$0xf] %v146_v44  ;;  %v148_v45 = vld [vmem:[%s4295_s7 + $0xd4] sm:$0xf]  ;;  %v150_v46 = vld [vmem:[%s4295_s7 + $0xc8] sm:$0xf] }
  0x1e   :  { %v152_v47 = vld [vmem:[%s4295_s7 + $0xd8] sm:$0xf]  ;;  %149 = vst [vmem:[#allocation2 + $0xcc] sm:$0xf] %v148_v45  ;;  %151 = vst [vmem:[#allocation2 + $0xd0] sm:$0xf] %v150_v46 }
  0x1f   :  { %153 = vst [vmem:[#allocation2 + $0xd4] sm:$0xf] %v152_v47  ;;  %v154_v48 = vld [vmem:[%s4295_s7 + $0xcc] sm:$0xf]  ;;  %v160_v50 = vld [vmem:[%s4295_s7 + $0xf0] sm:$0xf] }
  0x20   :  { %155 = vst [vmem:[#allocation2 + $0xd8] sm:$0xf] %v154_v48  ;;  %157 = vst [vmem:[#allocation2 + $0xdc] sm:$0xff] %v156_v49   ;;  %v162_v51 = vld [vmem:[%s4295_s7 + $0xe4] sm:$0xf]  ;;  %v172_v56 = vld [vmem:[%s4295_s7 + $0xfc] sm:$0xff]  }
  0x21   :  { %161 = vst [vmem:[#allocation2 + $0xe4] sm:$0xf] %v160_v50  ;;  %v164_v52 = vld [vmem:[%s4295_s7 + $0xf4] sm:$0xf]  ;;  %v166_v53 = vld [vmem:[%s4295_s7 + $0xe8] sm:$0xf] }
  0x22   :  { %163 = vst [vmem:[#allocation2 + $0xe8] sm:$0xf] %v162_v51  ;;  %165 = vst [vmem:[#allocation2 + $0xec] sm:$0xf] %v164_v52  ;;  %v168_v54 = vld [vmem:[%s4295_s7 + $0xf8] sm:$0xf] }
  0x23   :  { %167 = vst [vmem:[#allocation2 + $0xf0] sm:$0xf] %v166_v53  ;;  %v170_v55 = vld [vmem:[%s4295_s7 + $0xec] sm:$0xf]  ;;  %169 = vst [vmem:[#allocation2 + $0xf4] sm:$0xf] %v168_v54 }
  0x24   :  { %171 = vst [vmem:[#allocation2 + $0xf8] sm:$0xf] %v170_v55  ;;  %173 = vst [vmem:[#allocation2 + $0xfc] sm:$0xff] %v172_v56   ;;  %v176_v57 = vld [vmem:[%s4295_s7 + $0x110] sm:$0xf]  ;;  %v188_v63 = vld [vmem:[%s4295_s7 + $0x11c] sm:$0xff]  }
  0x25   :  { %v178_v58 = vld [vmem:[%s4295_s7 + $0x104] sm:$0xf]  ;;  %v180_v59 = vld [vmem:[%s4295_s7 + $0x114] sm:$0xf]  ;;  %177 = vst [vmem:[#allocation2 + $0x104] sm:$0xf] %v176_v57 }
  0x26   :  { %179 = vst [vmem:[#allocation2 + $0x108] sm:$0xf] %v178_v58  ;;  %181 = vst [vmem:[#allocation2 + $0x10c] sm:$0xf] %v180_v59  ;;  %v182_v60 = vld [vmem:[%s4295_s7 + $0x108] sm:$0xf] }
  0x27   :  { %v184_v61 = vld [vmem:[%s4295_s7 + $0x118] sm:$0xf]  ;;  %v186_v62 = vld [vmem:[%s4295_s7 + $0x10c] sm:$0xf]  ;;  %183 = vst [vmem:[#allocation2 + $0x110] sm:$0xf] %v182_v60 }
  0x28   :  { %185 = vst [vmem:[#allocation2 + $0x114] sm:$0xf] %v184_v61  ;;  %187 = vst [vmem:[#allocation2 + $0x118] sm:$0xf] %v186_v62  ;;  %v192_v0 = vld [vmem:[%s4295_s7 + $0x130] sm:$0xf] }
  0x29   :  { %v194_v1 = vld [vmem:[%s4295_s7 + $0x124] sm:$0xf]  ;;  %189 = vst [vmem:[#allocation2 + $0x11c] sm:$0xff] %v188_v63   ;;  %193 = vst [vmem:[#allocation2 + $0x124] sm:$0xf] %v192_v0  ;;  %v204_v6 = vld [vmem:[%s4295_s7 + $0x13c] sm:$0xff]  }
  0x2a   :  { %195 = vst [vmem:[#allocation2 + $0x128] sm:$0xf] %v194_v1  ;;  %v196_v2 = vld [vmem:[%s4295_s7 + $0x134] sm:$0xf]  ;;  %v198_v3 = vld [vmem:[%s4295_s7 + $0x128] sm:$0xf] }
  0x2b   :  { %v200_v4 = vld [vmem:[%s4295_s7 + $0x138] sm:$0xf]  ;;  %197 = vst [vmem:[#allocation2 + $0x12c] sm:$0xf] %v196_v2  ;;  %199 = vst [vmem:[#allocation2 + $0x130] sm:$0xf] %v198_v3 }
  0x2c   :  { %201 = vst [vmem:[#allocation2 + $0x134] sm:$0xf] %v200_v4  ;;  %v202_v5 = vld [vmem:[%s4295_s7 + $0x12c] sm:$0xf]  ;;  %v208_v7 = vld [vmem:[%s4295_s7 + $0x150] sm:$0xf] }
  0x2d   :  { %203 = vst [vmem:[#allocation2 + $0x138] sm:$0xf] %v202_v5  ;;  %205 = vst [vmem:[#allocation2 + $0x13c] sm:$0xff] %v204_v6   ;;  %v210_v8 = vld [vmem:[%s4295_s7 + $0x144] sm:$0xf]  ;;  %v220_v13 = vld [vmem:[%s4295_s7 + $0x15c] sm:$0xff]  }
  0x2e   :  { %209 = vst [vmem:[#allocation2 + $0x144] sm:$0xf] %v208_v7  ;;  %v212_v9 = vld [vmem:[%s4295_s7 + $0x154] sm:$0xf]  ;;  %v214_v10 = vld [vmem:[%s4295_s7 + $0x148] sm:$0xf] }
  0x2f   :  { %211 = vst [vmem:[#allocation2 + $0x148] sm:$0xf] %v210_v8  ;;  %213 = vst [vmem:[#allocation2 + $0x14c] sm:$0xf] %v212_v9  ;;  %v216_v11 = vld [vmem:[%s4295_s7 + $0x158] sm:$0xf] }
  0x30   :  { %215 = vst [vmem:[#allocation2 + $0x150] sm:$0xf] %v214_v10  ;;  %v218_v12 = vld [vmem:[%s4295_s7 + $0x14c] sm:$0xf]  ;;  %217 = vst [vmem:[#allocation2 + $0x154] sm:$0xf] %v216_v11 }
  0x31   :  { %219 = vst [vmem:[#allocation2 + $0x158] sm:$0xf] %v218_v12  ;;  %221 = vst [vmem:[#allocation2 + $0x15c] sm:$0xff] %v220_v13   ;;  %v224_v14 = vld [vmem:[%s4295_s7 + $0x170] sm:$0xf]  ;;  %v236_v20 = vld [vmem:[%s4295_s7 + $0x17c] sm:$0xff]  }
  0x32   :  { %v226_v15 = vld [vmem:[%s4295_s7 + $0x164] sm:$0xf]  ;;  %v228_v16 = vld [vmem:[%s4295_s7 + $0x174] sm:$0xf]  ;;  %225 = vst [vmem:[#allocation2 + $0x164] sm:$0xf] %v224_v14 }
  0x33   :  { %227 = vst [vmem:[#allocation2 + $0x168] sm:$0xf] %v226_v15  ;;  %229 = vst [vmem:[#allocation2 + $0x16c] sm:$0xf] %v228_v16  ;;  %v230_v17 = vld [vmem:[%s4295_s7 + $0x168] sm:$0xf] }
  0x34   :  { %v232_v18 = vld [vmem:[%s4295_s7 + $0x178] sm:$0xf]  ;;  %v234_v19 = vld [vmem:[%s4295_s7 + $0x16c] sm:$0xf]  ;;  %231 = vst [vmem:[#allocation2 + $0x170] sm:$0xf] %v230_v17 }
  0x35   :  { %233 = vst [vmem:[#allocation2 + $0x174] sm:$0xf] %v232_v18  ;;  %235 = vst [vmem:[#allocation2 + $0x178] sm:$0xf] %v234_v19  ;;  %v240_v21 = vld [vmem:[%s4295_s7 + $0x190] sm:$0xf] }
  0x36   :  { %v242_v22 = vld [vmem:[%s4295_s7 + $0x184] sm:$0xf]  ;;  %237 = vst [vmem:[#allocation2 + $0x17c] sm:$0xff] %v236_v20   ;;  %241 = vst [vmem:[#allocation2 + $0x184] sm:$0xf] %v240_v21  ;;  %v252_v27 = vld [vmem:[%s4295_s7 + $0x19c] sm:$0xff]  }
  0x37   :  { %243 = vst [vmem:[#allocation2 + $0x188] sm:$0xf] %v242_v22  ;;  %v244_v23 = vld [vmem:[%s4295_s7 + $0x194] sm:$0xf]  ;;  %v246_v24 = vld [vmem:[%s4295_s7 + $0x188] sm:$0xf] }
  0x38   :  { %v248_v25 = vld [vmem:[%s4295_s7 + $0x198] sm:$0xf]  ;;  %245 = vst [vmem:[#allocation2 + $0x18c] sm:$0xf] %v244_v23  ;;  %247 = vst [vmem:[#allocation2 + $0x190] sm:$0xf] %v246_v24 }
  0x39   :  { %249 = vst [vmem:[#allocation2 + $0x194] sm:$0xf] %v248_v25  ;;  %v250_v26 = vld [vmem:[%s4295_s7 + $0x18c] sm:$0xf]  ;;  %v256_v28 = vld [vmem:[%s4295_s7 + $0x1b0] sm:$0xf] }
  0x3a   :  { %251 = vst [vmem:[#allocation2 + $0x198] sm:$0xf] %v250_v26  ;;  %253 = vst [vmem:[#allocation2 + $0x19c] sm:$0xff] %v252_v27   ;;  %v258_v29 = vld [vmem:[%s4295_s7 + $0x1a4] sm:$0xf]  ;;  %v268_v34 = vld [vmem:[%s4295_s7 + $0x1bc] sm:$0xff]  }
  0x3b   :  { %257 = vst [vmem:[#allocation2 + $0x1a4] sm:$0xf] %v256_v28  ;;  %v260_v30 = vld [vmem:[%s4295_s7 + $0x1b4] sm:$0xf]  ;;  %v262_v31 = vld [vmem:[%s4295_s7 + $0x1a8] sm:$0xf] }
  0x3c   :  { %259 = vst [vmem:[#allocation2 + $0x1a8] sm:$0xf] %v258_v29  ;;  %261 = vst [vmem:[#allocation2 + $0x1ac] sm:$0xf] %v260_v30  ;;  %v264_v32 = vld [vmem:[%s4295_s7 + $0x1b8] sm:$0xf] }
  0x3d   :  { %263 = vst [vmem:[#allocation2 + $0x1b0] sm:$0xf] %v262_v31  ;;  %v266_v33 = vld [vmem:[%s4295_s7 + $0x1ac] sm:$0xf]  ;;  %265 = vst [vmem:[#allocation2 + $0x1b4] sm:$0xf] %v264_v32 }
  0x3e   :  { %267 = vst [vmem:[#allocation2 + $0x1b8] sm:$0xf] %v266_v33  ;;  %269 = vst [vmem:[#allocation2 + $0x1bc] sm:$0xff] %v268_v34   ;;  %v272_v35 = vld [vmem:[%s4295_s7 + $0x1d0] sm:$0xf]  ;;  %v284_v41 = vld [vmem:[%s4295_s7 + $0x1dc] sm:$0xff]  }
  0x3f   :  { %v274_v36 = vld [vmem:[%s4295_s7 + $0x1c4] sm:$0xf]  ;;  %v276_v37 = vld [vmem:[%s4295_s7 + $0x1d4] sm:$0xf]  ;;  %273 = vst [vmem:[#allocation2 + $0x1c4] sm:$0xf] %v272_v35 }
  0x40   :  { %275 = vst [vmem:[#allocation2 + $0x1c8] sm:$0xf] %v274_v36  ;;  %277 = vst [vmem:[#allocation2 + $0x1cc] sm:$0xf] %v276_v37  ;;  %v278_v38 = vld [vmem:[%s4295_s7 + $0x1c8] sm:$0xf] }
  0x41   :  { %v280_v39 = vld [vmem:[%s4295_s7 + $0x1d8] sm:$0xf]  ;;  %v282_v40 = vld [vmem:[%s4295_s7 + $0x1cc] sm:$0xf]  ;;  %279 = vst [vmem:[#allocation2 + $0x1d0] sm:$0xf] %v278_v38 }
  0x42   :  { %281 = vst [vmem:[#allocation2 + $0x1d4] sm:$0xf] %v280_v39  ;;  %283 = vst [vmem:[#allocation2 + $0x1d8] sm:$0xf] %v282_v40  ;;  %v288_v42 = vld [vmem:[%s4295_s7 + $0x1f0] sm:$0xf] }
  0x43   :  { %v290_v43 = vld [vmem:[%s4295_s7 + $0x1e4] sm:$0xf]  ;;  %285 = vst [vmem:[#allocation2 + $0x1dc] sm:$0xff] %v284_v41   ;;  %289 = vst [vmem:[#allocation2 + $0x1e4] sm:$0xf] %v288_v42 }
  0x44   :  { %291 = vst [vmem:[#allocation2 + $0x1e8] sm:$0xf] %v290_v43  ;;  %v292_v44 = vld [vmem:[%s4295_s7 + $0x1f4] sm:$0xf]  ;;  %v294_v45 = vld [vmem:[%s4295_s7 + $0x1e8] sm:$0xf] }
  0x45   :  { %v296_v46 = vld [vmem:[%s4295_s7 + $0x1f8] sm:$0xf]  ;;  %293 = vst [vmem:[#allocation2 + $0x1ec] sm:$0xf] %v292_v44  ;;  %295 = vst [vmem:[#allocation2 + $0x1f0] sm:$0xf] %v294_v45 }
  0x46   :  { %297 = vst [vmem:[#allocation2 + $0x1f4] sm:$0xf] %v296_v46  ;;  %v298_v47 = vld [vmem:[%s4295_s7 + $0x1ec] sm:$0xf]  ;;  %v300_v48 = vld [vmem:[%s4295_s7 + $0x1fc] sm:$0xf] }
  0x47   :  { %299 = vst [vmem:[#allocation2 + $0x1f8] sm:$0xf] %v298_v47  ;;  %301 = vst [vmem:[#allocation2 + $0x1fc] sm:$0xf] %v300_v48 }
  0x48   :  { %588 = vsyncadd [#allocation4], 8192  ;;  %v3618_v49 = vld [vmem:[%s4296_s8] sm:$0xff]  ;;  %v3623_v50 = vld [vmem:[%s4296_s8 + $0x8] sm:$0xff] }
  0x49   :  { %v3628_v51 = vld [vmem:[%s4296_s8 + $0x10] sm:$0xff]  ;;  %v3633_v52 = vld [vmem:[%s4296_s8 + $0x18] sm:$0xff]  ;;  %v3638_v53 = vld [vmem:[%s4296_s8 + $0x20] sm:$0xff] }
  0x4a   :  { %v3643_v54 = vld [vmem:[%s4296_s8 + $0x28] sm:$0xff]  ;;  %v3648_v55 = vld [vmem:[%s4296_s8 + $0x30] sm:$0xff]  ;;  %v3653_v56 = vld [vmem:[%s4296_s8 + $0x38] sm:$0xff] }
  0x4b   :  { %v3658_v57 = vld [vmem:[%s4296_s8 + $0x40] sm:$0xff]  ;;  %v3663_v58 = vld [vmem:[%s4296_s8 + $0x48] sm:$0xff]  ;;  %v3668_v59 = vld [vmem:[%s4296_s8 + $0x50] sm:$0xff] }
  0x4c   :  { %v3673_v60 = vld [vmem:[%s4296_s8 + $0x58] sm:$0xff]  ;;  %v3678_v61 = vld [vmem:[%s4296_s8 + $0x60] sm:$0xff]  ;;  %v3683_v62 = vld [vmem:[%s4296_s8 + $0x68] sm:$0xff] }
  0x4d   :  { %v3688_v63 = vld [vmem:[%s4296_s8 + $0x70] sm:$0xff]  ;;  %v3693_v0 = vld [vmem:[%s4296_s8 + $0x78] sm:$0xff]  ;;  %v3698_v1 = vld [vmem:[%s4296_s8 + $0x80] sm:$0xff] }
  0x4e   :  { %v3703_v2 = vld [vmem:[%s4296_s8 + $0x88] sm:$0xff]  ;;  %v3708_v3 = vld [vmem:[%s4296_s8 + $0x90] sm:$0xff]  ;;  %v3713_v4 = vld [vmem:[%s4296_s8 + $0x98] sm:$0xff] }
  0x4f   :  { %v3718_v5 = vld [vmem:[%s4296_s8 + $0xa0] sm:$0xff]  ;;  %v3723_v6 = vld [vmem:[%s4296_s8 + $0xa8] sm:$0xff]  ;;  %v3728_v7 = vld [vmem:[%s4296_s8 + $0xb0] sm:$0xff] }
  0x50   :  { %v3733_v8 = vld [vmem:[%s4296_s8 + $0xb8] sm:$0xff]  ;;  %v3738_v9 = vld [vmem:[%s4296_s8 + $0xc0] sm:$0xff]  ;;  %v3743_v10 = vld [vmem:[%s4296_s8 + $0xc8] sm:$0xff] }
  0x51   :  { %v3748_v11 = vld [vmem:[%s4296_s8 + $0xd0] sm:$0xff]  ;;  %v3753_v12 = vld [vmem:[%s4296_s8 + $0xd8] sm:$0xff]  ;;  %v3758_v13 = vld [vmem:[%s4296_s8 + $0xe0] sm:$0xff] }
  0x52   :  { %v3763_v14 = vld [vmem:[%s4296_s8 + $0xe8] sm:$0xff]  ;;  %v3768_v15 = vld [vmem:[%s4296_s8 + $0xf0] sm:$0xff]  ;;  %v3773_v16 = vld [vmem:[%s4296_s8 + $0xf8] sm:$0xff] }
  0x53   :  { %693 = vsyncadd [#allocation4 + $0x1], 4096  ;;  %v3778_v17 = vld [vmem:[%s4294_s6 + $0x3] ss:$8 sm:$0xf]  ;;  %vm1128_vm0 = vcmask 818176  }
  0x54   :  { %v3094_v18 = vld [vmem:[%s4289_s1 + $0x40] sm:$0xff]   ;;  %v3096_v21 = vld [vmem:[%s4289_s1 + $0x48] sm:$0xff]   ;;  %v3098_v23 = vld [vmem:[%s4289_s1 + $0x50] sm:$0xff]   ;;  %vm1177_vm1 = vcmask 1041408   ;;  %s3221_s24 = smov 32   ;;  %s3222_s13 = smov 96  }
  0x55   :  { %v3786_v19 = vld [vmem:[%s4294_s6 + $0x4] ss:$0 sm:$0xff]  ;;  %2794 = vmatprep.subr.bf16.mxu0 %v3094_v18  ;;  %v3097_v22 = vld [vmem:[%s4289_s1 + $0x8] sm:$0xff]   ;;  %v3099_v24 = vld [vmem:[%s4289_s1 + $0x10] sm:$0xff]   ;;  %s3223_s14 = smov 64   ;;  %vm1394_vm2 = vcmask 261120  }
  0x56   :  { %v3095_v20 = vld [vmem:[%s4289_s1] sm:$0xff]   ;;  %v3100_v25 = vld [vmem:[%s4289_s1 + $0x58] sm:$0xff]   ;;  %v3104_v29 = vld [vmem:[%s4289_s1 + $0x68] sm:$0xff]   ;;  %vm1398_vm3 = vcmask 523264   ;;  %vm1401_vm4 = vcmask 785408   ;;  %vm3225_vm5 = vmmov 0  }
  0x57   :  { %2795 = vmatpush3.bf16.msra.mxu0 %v3095_v20  ;;  %v3101_v26 = vld [vmem:[%s4289_s1 + $0x18] sm:$0xff]   ;;  %v3102_v27 = vld [vmem:[%s4289_s1 + $0x60] sm:$0xff]   ;;  %v3105_v31 = vld [vmem:[%s4289_s1 + $0x28] sm:$0xff]   ;;  %vm1788_vm6 = vcmask 130048  }
  0x58   :  { %2796 = vmatprep.subr.bf16.mxu0 %v3096_v21  ;;  %v3103_v28 = vld [vmem:[%s4289_s1 + $0x20] sm:$0xff]   ;;  %v3106_v32 = vld [vmem:[%s4289_s1 + $0x70] sm:$0xff]   ;;  %v3108_v34 = vld [vmem:[%s4289_s1 + $0x78] sm:$0xff]  }
  0x59   :  { %v3112_v30 = vld [vmem:[%s4288_s0 + $0x4] ss:$8 sps:$4 sm:$0xff]   ;;  %v3107_v33 = vld [vmem:[%s4289_s1 + $0x30] sm:$0xff]   ;;  %v3109_v35 = vld [vmem:[%s4289_s1 + $0x38] sm:$0xff]  }
  0x5a   :  { %940 = vmatprep.mubr.bf16.mxu0 %v3112_v30  ;;  %v3110_v36 = vld [vmem:[%s4288_s0] ss:$8 sps:$4 sm:$0xff]   ;;  %v3113_v37 = vld [vmem:[%s4288_s0 + $0x14] ss:$8 sps:$4 sm:$0xff]   ;;  %v3115_v38 = vld [vmem:[%s4288_s0 + $0x10] ss:$8 sps:$4 sm:$0xff]  }
  0x5b   :  { %2797 = vmatpush3.bf16.msra.mxu0 %v3097_v22  ;;  %v3116_v39 = vld [vmem:[%s4288_s0 + $0x24] ss:$8 sps:$4 sm:$0xff]   ;;  %v3118_v40 = vld [vmem:[%s4288_s0 + $0x20] ss:$8 sps:$4 sm:$0xff]   ;;  %v3119_v41 = vld [vmem:[%s4288_s0 + $0x34] ss:$8 sps:$4 sm:$0xff]  }
  0x5c   :  { %2798 = vmatprep.subr.bf16.mxu0 %v3098_v23  ;;  %v3121_v42 = vld [vmem:[%s4288_s0 + $0x30] ss:$8 sps:$4 sm:$0xff]   ;;  %v3122_v43 = vld [vmem:[%s4288_s0 + $0x44] ss:$8 sps:$4 sm:$0xff]   ;;  %v3124_v44 = vld [vmem:[%s4288_s0 + $0x40] ss:$8 sps:$4 sm:$0xff]  }
  0x5d   :  { %v3125_v45 = vld [vmem:[%s4288_s0 + $0x54] ss:$8 sps:$4 sm:$0xff]   ;;  %v712_v46 = vld [vmem:[%s4288_s0 + $0x60] sm:$0x33]  ;;  %v3127_v47 = vld [vmem:[%s4288_s0 + $0x50] ss:$8 sps:$4 sm:$0xff]  }
  0x5e   :  { %v2668_v48 = vcombine.high %v712_v46, %v712_v46  ;;  %v2667_v18 = vcombine.low %v712_v46, %v712_v46  ;;  %v3130_v20 = vld [vmem:[%s4290_s2] sm:$0xff]  }
  0x5f   :  { %2799 = vmatpush3.bf16.msra.mxu0 %v3099_v24  ;;  %3030 = vmatprep.mubr.msk.bf16.mxu1 %vm1128_vm0, %v3130_v20  ;;  %v3879_v22 = vld [vmem:[%s4294_s6] ss:$0 sm:$0xff] }
  0x60   :  { %2800 = vmatprep.subr.bf16.mxu0 %v3100_v25 }
  0x63   :  { %2801 = vmatpush3.bf16.msra.mxu0 %v3101_v26 }
  0x64   :  { %2802 = vmatprep.subr.bf16.mxu0 %v3102_v27 }
  0x67   :  { %2803 = vmatpush3.bf16.msra.mxu0 %v3103_v28 }
  0x68   :  { %2804 = vmatprep.subr.bf16.mxu0 %v3104_v29 }
  0x6b   :  { %2805 = vmatpush3.bf16.msra.mxu0 %v3105_v31 }
  0x6c   :  { %2806 = vmatprep.subr.bf16.mxu0 %v3106_v32 }
  0x6f   :  { %2807 = vmatpush3.bf16.msra.mxu0 %v3107_v33 }
  0x70   :  { %2808 = vmatprep.subr.bf16.mxu0 %v3108_v34 }
  0x73   :  { %2809 = vmatpush3.bf16.msra.mxu0 %v3109_v35 }
  0x76   :  { %941 = vmatmul.mubr.bf16.vlgmr.msra.gmra.mrb[0].mxu0 %v3110_v36 }
  0x77   :  { %948 = vmatprep.mubr.bf16.mxu0 %v3113_v37 }
  0x7e   :  { %949 = vmatmul.mubr.bf16.gmra.mrb[4].mxu0 %v3115_v38 }
  0x7f   :  { %956 = vmatprep.mubr.bf16.mxu0 %v3116_v39 }
  0x86   :  { %957 = vmatmul.mubr.bf16.gmra.mrb[8].mxu0 %v3118_v40 }
  0x87   :  { %964 = vmatprep.mubr.bf16.mxu0 %v3119_v41 }
  0x8e   :  { %965 = vmatmul.mubr.bf16.gmra.mrb[12].mxu0 %v3121_v42 }
  0x8f   :  { %972 = vmatprep.mubr.bf16.mxu0 %v3122_v43 }
  0x96   :  { %973 = vmatmul.mubr.bf16.gmra.mrb[16].mxu0 %v3124_v44 }
  0x97   :  { %980 = vmatprep.mubr.bf16.mxu0 %v3125_v45 }
  0x9e   :  { %981 = vmatmul.mubr.bf16.gmra.mrb[20].mxu0 %v3127_v47 }
  0x9f   :  { %988 = vmatprep.mubr.bf16.mxu0 %v2668_v48 }
  0xa6   :  { %989 = vmatmul.mubr.bf16.gmra.mrb[24].mxu0 %v2667_v18 }
 0x149   :  { %v2810_v21 = vpop.f32.mrb[0].mxu0 }
 0x14a   :  { %v2811_v23 = vpop.f32.mrb[1].mxu0 }
 0x14b   :  { %v2812_v24 = vadd.f32 %v2811_v23, %v2810_v21  ;;  %v2813_v25 = vpop.f32.mrb[2].mxu0 }
 0x14c   :  { %v2814_v26 = vpop.f32.mrb[3].mxu0 }
 0x14d   :  { %v943_v27 = vadd.f32 %v2812_v24, %v3879_v22  ;;  %v2815_v28 = vadd.f32 %v2814_v26, %v2813_v25 }
 0x14f   :  { %v946_v29 = vadd.f32 %v2815_v28, %v3879_v22  ;;  %v996_v30 = vmax.f32 %v943_v27, 0.0 }
 0x151   :  { %v997_v31 = vmax.f32 %v946_v29, 0.0  ;;  %v2816_v32 = vpop.f32.mrb[4].mxu0 }
 0x152   :  { %v2817_v33 = vpop.f32.mrb[5].mxu0 }
 0x153   :  { %v2818_v34 = vadd.f32 %v2817_v33, %v2816_v32  ;;  %v2819_v35 = vpop.f32.mrb[6].mxu0  ;;  %v1009_v36 = vpack.c.bf16 %v997_v31, %v996_v30 }
 0x154   :  { %v2820_v37 = vpop.f32.mrb[7].mxu0 }
 0x155   :  { %v951_v38 = vadd.f32 %v2818_v34, %v3879_v22  ;;  %v2821_v39 = vadd.f32 %v2820_v37, %v2819_v35  ;;  %3016 = vmatprep.subr.bf16.mxu1 %v1009_v36 }
 0x156   :  { %3017 = vmatpush3.bf16.msra.mxu1 %v1009_v36 }
 0x157   :  { %v954_v40 = vadd.f32 %v2821_v39, %v3879_v22  ;;  %v998_v41 = vmax.f32 %v951_v38, 0.0 }
 0x159   :  { %v999_v42 = vmax.f32 %v954_v40, 0.0  ;;  %v2822_v43 = vpop.f32.mrb[8].mxu0 }
 0x15a   :  { %v2823_v44 = vpop.f32.mrb[9].mxu0 }
 0x15b   :  { %v2824_v45 = vadd.f32 %v2823_v44, %v2822_v43  ;;  %v2825_v46 = vpop.f32.mrb[10].mxu0  ;;  %v1010_v47 = vpack.c.bf16 %v999_v42, %v998_v41 }
 0x15c   :  { %v2826_v48 = vpop.f32.mrb[11].mxu0 }
 0x15d   :  { %v959_v18 = vadd.f32 %v2824_v45, %v3879_v22  ;;  %v2827_v20 = vadd.f32 %v2826_v48, %v2825_v46  ;;  %3018 = vmatprep.subr.bf16.mxu1 %v1010_v47 }
 0x15e   :  { %3019 = vmatpush3.bf16.msra.mxu1 %v1010_v47 }
 0x15f   :  { %v962_v21 = vadd.f32 %v2827_v20, %v3879_v22  ;;  %v1000_v23 = vmax.f32 %v959_v18, 0.0 }
 0x161   :  { %v1001_v24 = vmax.f32 %v962_v21, 0.0  ;;  %v2828_v25 = vpop.f32.mrb[12].mxu0 }
 0x162   :  { %v2829_v26 = vpop.f32.mrb[13].mxu0 }
 0x163   :  { %v2830_v27 = vadd.f32 %v2829_v26, %v2828_v25  ;;  %v2831_v28 = vpop.f32.mrb[14].mxu0  ;;  %v1011_v29 = vpack.c.bf16 %v1001_v24, %v1000_v23 }
 0x164   :  { %v2832_v30 = vpop.f32.mrb[15].mxu0 }
 0x165   :  { %v967_v31 = vadd.f32 %v2830_v27, %v3879_v22  ;;  %v2833_v32 = vadd.f32 %v2832_v30, %v2831_v28  ;;  %3020 = vmatprep.subr.bf16.mxu1 %v1011_v29 }
 0x166   :  { %3021 = vmatpush3.bf16.msra.mxu1 %v1011_v29 }
 0x167   :  { %v970_v33 = vadd.f32 %v2833_v32, %v3879_v22  ;;  %v1002_v34 = vmax.f32 %v967_v31, 0.0 }
 0x169   :  { %v1003_v35 = vmax.f32 %v970_v33, 0.0  ;;  %v2834_v36 = vpop.f32.mrb[16].mxu0 }
 0x16a   :  { %v2835_v37 = vpop.f32.mrb[17].mxu0 }
 0x16b   :  { %v2836_v38 = vadd.f32 %v2835_v37, %v2834_v36  ;;  %v2837_v39 = vpop.f32.mrb[18].mxu0  ;;  %v1012_v40 = vpack.c.bf16 %v1003_v35, %v1002_v34 }
 0x16c   :  { %v2838_v41 = vpop.f32.mrb[19].mxu0 }
 0x16d   :  { %v975_v42 = vadd.f32 %v2836_v38, %v3879_v22  ;;  %v2839_v43 = vadd.f32 %v2838_v41, %v2837_v39  ;;  %3022 = vmatprep.subr.bf16.mxu1 %v1012_v40  ;;  %v3131_v39 = vld [vmem:[%s4290_s2 + $0x8] sm:$0xff]   ;;  %v3134_v41 = vld [vmem:[%s4290_s2 + $0x20] sm:$0xff]  }
 0x16e   :  { %3023 = vmatpush3.bf16.msra.mxu1 %v1012_v40  ;;  %v3132_v40 = vld [vmem:[%s4290_s2 + $0x10] sm:$0xff]  }
 0x16f   :  { %v978_v44 = vadd.f32 %v2839_v43, %v3879_v22  ;;  %v1004_v45 = vmax.f32 %v975_v42, 0.0  ;;  %v3135_v42 = vld [vmem:[%s4290_s2 + $0x28] sm:$0xff]   ;;  %v3136_v43 = vld [vmem:[%s4290_s2 + $0x30] sm:$0xff]  }
 0x171   :  { %v1005_v46 = vmax.f32 %v978_v44, 0.0  ;;  %v2840_v47 = vpop.f32.mrb[20].mxu0  ;;  %v3137_v44 = vld [vmem:[%s4290_s2 + $0x38] sm:$0xff]  }
 0x172   :  { %v2841_v48 = vpop.f32.mrb[21].mxu0 }
 0x173   :  { %v2842_v18 = vadd.f32 %v2841_v48, %v2840_v47  ;;  %v2843_v20 = vpop.f32.mrb[22].mxu0  ;;  %v1013_v21 = vpack.c.bf16 %v1005_v46, %v1004_v45  ;;  %v3138_v45 = vld [vmem:[%s4290_s2 + $0x40] sm:$0xff]   ;;  %v3139_v46 = vld [vmem:[%s4290_s2 + $0x48] sm:$0xff]   ;;  %v3140_v47 = vld [vmem:[%s4290_s2 + $0x50] sm:$0xff]  }
 0x174   :  { %v2844_v23 = vpop.f32.mrb[23].mxu0  ;;  %v3141_v48 = vld [vmem:[%s4290_s2 + $0x58] sm:$0xff]  }
 0x175   :  { %v983_v24 = vadd.f32 %v2842_v18, %v3879_v22  ;;  %v2845_v25 = vadd.f32 %v2844_v23, %v2843_v20  ;;  %3024 = vmatprep.subr.bf16.mxu1 %v1013_v21  ;;  %v3142_v18 = vld [vmem:[%s4290_s2 + $0x60] sm:$0xff]   ;;  %v3143_v20 = vld [vmem:[%s4290_s2 + $0x68] sm:$0xff]   ;;  %v3145_v23 = vld [vmem:[%s4290_s2 + $0x78] sm:$0xff]  }
 0x176   :  { %3025 = vmatpush3.bf16.msra.mxu1 %v1013_v21  ;;  %v3144_v21 = vld [vmem:[%s4290_s2 + $0x70] sm:$0xff]  }
 0x177   :  { %v986_v26 = vadd.f32 %v2845_v25, %v3879_v22  ;;  %v1006_v27 = vmax.f32 %v983_v24, 0.0  ;;  %v3146_v24 = vld [vmem:[%s4291_s3 + $0x40] sm:$0xff]  }
 0x178   :  { %v3147_v25 = vld [vmem:[%s4291_s3] sm:$0xff]   ;;  %2875 = vmatprep.subr.bf16.mxu0 %v3146_v24 }
 0x179   :  { %v1007_v28 = vmax.f32 %v986_v26, 0.0  ;;  %v2846_v29 = vpop.f32.mrb[24].mxu0  ;;  %2876 = vmatpush3.bf16.msra.mxu0 %v3147_v25  ;;  %v3148_v26 = vld [vmem:[%s4291_s3 + $0x48] sm:$0xff]  }
 0x17a   :  { %v2847_v30 = vpop.f32.mrb[25].mxu0  ;;  %2877 = vmatprep.subr.bf16.mxu0 %v3148_v26  ;;  %v3166_v26 = vld [vmem:[%s4291_s3 + $0x78] sm:$0xff]  }
 0x17b   :  { %v2848_v31 = vadd.f32 %v2847_v30, %v2846_v29  ;;  %v2849_v32 = vpop.f32.mrb[26].mxu0  ;;  %v1014_v33 = vpack.c.bf16 %v1007_v28, %v1006_v27  ;;  %v3149_v27 = vld [vmem:[%s4291_s3 + $0x8] sm:$0xff]   ;;  %v3150_v28 = vld [vmem:[%s4291_s3 + $0xc0] sm:$0xff]   ;;  %v3151_v29 = vld [vmem:[%s4291_s3 + $0x50] sm:$0xff]  }
 0x17c   :  { %v2850_v34 = vpop.f32.mrb[27].mxu0  ;;  %v3152_v30 = vld [vmem:[%s4291_s3 + $0x80] sm:$0xff]   ;;  %v3154_v32 = vld [vmem:[%s4291_s3 + $0x58] sm:$0xff]  }
 0x17d   :  { %v991_v35 = vadd.f32 %v2848_v31, %v3879_v22  ;;  %3026 = vmatprep.subr.bf16.mxu1 %v1014_v33  ;;  %v3133_v22 = vld [vmem:[%s4290_s2 + $0x18] sm:$0xff]   ;;  %2878 = vmatpush3.bf16.msra.mxu0 %v3149_v27  ;;  %v3153_v31 = vld [vmem:[%s4291_s3 + $0x10] sm:$0xff]  }
 0x17e   :  { %3027 = vmatpush3.bf16.msra.mxu1 %v1014_v33  ;;  %2879 = vmatprep.subr.bf16.mxu0 %v3151_v29  ;;  %v3155_v33 = vld [vmem:[%s4291_s3 + $0x18] sm:$0xff]  }
 0x17f   :  { %v1008_v36 = vmax.f32 %v991_v35, 0.0  ;;  %v3167_v27 = vld [vmem:[%s4291_s3 + $0x38] sm:$0xff]  }
 0x181   :  { %v1015_v37 = vpack.c.bf16 %v1008_v36, %v1008_v36  ;;  %2880 = vmatpush3.bf16.msra.mxu0 %v3153_v31 }
 0x182   :  { %2881 = vmatprep.subr.bf16.mxu0 %v3154_v32 }
 0x183   :  { %3088 = vmatprep.subr.msk.bf16.mxu1 %vm1177_vm1, %v1015_v37  ;;  %v1179_v38 = vsel %vm1177_vm1, %v1015_v37, 0  ;;  %v3156_v37 = vld [vmem:[%s4291_s3 + $0xc8] sm:$0xff]  }
 0x184   :  { %3029 = vmatpush3.bf16.msra.mxu1 %v1179_v38  ;;  %v3157_v38 = vld [vmem:[%s4291_s3 + $0x60] sm:$0xff]  }
 0x185   :  { %2897 = vmatprep.subr.bf16.mxu1 %v3150_v28  ;;  %2882 = vmatpush3.bf16.msra.mxu0 %v3155_v33  ;;  %v3168_v33 = vld [vmem:[%s4291_s3 + $0xd8] sm:$0xff]  }
 0x186   :  { %2883 = vmatprep.subr.bf16.mxu0 %v3157_v38  ;;  %v3170_v38 = vld [vmem:[%s4291_s3 + $0xe0] sm:$0xff]  }
 0x187   :  { %3031 = vmatmul.mubr.msk.bf16.vlgmr.msra.gmra.mrb[0].mxu1 %vm1128_vm0, %v3131_v39  ;;  %v3158_v39 = vld [vmem:[%s4291_s3 + $0x88] sm:$0xff]  }
 0x188   :  { %3034 = vmatprep.mubr.msk.bf16.mxu1 %vm1128_vm0, %v3132_v40  ;;  %2898 = vmatpush3.bf16.msra.mxu1 %v3152_v30 }
 0x189   :  { %2899 = vmatprep.subr.bf16.mxu1 %v3156_v37 }
 0x18c   :  { %2900 = vmatpush3.bf16.msra.mxu1 %v3158_v39  ;;  %v3171_v39 = vld [vmem:[%s4291_s3 + $0xa0] sm:$0xff]  }
 0x18f   :  { %3035 = vmatmul.mubr.msk.bf16.gmra.mrb[4].mxu1 %vm1128_vm0, %v3133_v22 }
 0x190   :  { %3038 = vmatprep.mubr.msk.bf16.mxu1 %vm1128_vm0, %v3134_v41  ;;  %v3159_v41 = vld [vmem:[%s4291_s3 + $0x20] sm:$0xff]  }
 0x191   :  { %2884 = vmatpush3.bf16.msra.mxu0 %v3159_v41 }
 0x197   :  { %3039 = vmatmul.mubr.msk.bf16.gmra.mrb[8].mxu1 %vm1128_vm0, %v3135_v42 }
 0x198   :  { %3042 = vmatprep.mubr.msk.bf16.mxu1 %vm1128_vm0, %v3136_v43  ;;  %v3160_v43 = vld [vmem:[%s4291_s3 + $0x68] sm:$0xff]  }
 0x199   :  { %2885 = vmatprep.subr.bf16.mxu0 %v3160_v43 }
 0x19f   :  { %3043 = vmatmul.mubr.msk.bf16.gmra.mrb[12].mxu1 %vm1128_vm0, %v3137_v44  ;;  %v3161_v44 = vld [vmem:[%s4291_s3 + $0x28] sm:$0xff]  }
 0x1a0   :  { %3046 = vmatprep.mubr.msk.bf16.mxu1 %vm1128_vm0, %v3138_v45  ;;  %2886 = vmatpush3.bf16.msra.mxu0 %v3161_v44 }
 0x1a7   :  { %3047 = vmatmul.mubr.msk.bf16.gmra.mrb[16].mxu1 %vm1128_vm0, %v3139_v46  ;;  %v3162_v46 = vld [vmem:[%s4291_s3 + $0xd0] sm:$0xff]  }
 0x1a8   :  { %3050 = vmatprep.mubr.msk.bf16.mxu1 %vm1128_vm0, %v3140_v47  ;;  %v3163_v47 = vld [vmem:[%s4291_s3 + $0x70] sm:$0xff]   ;;  %2901 = vmatprep.subr.bf16.mxu1 %v3162_v46 }
 0x1a9   :  { %2887 = vmatprep.subr.bf16.mxu0 %v3163_v47 }
 0x1af   :  { %3051 = vmatmul.mubr.msk.bf16.gmra.mrb[20].mxu1 %vm1128_vm0, %v3141_v48  ;;  %v3164_v48 = vld [vmem:[%s4291_s3 + $0x90] sm:$0xff]  }
 0x1b0   :  { %3054 = vmatprep.mubr.msk.bf16.mxu1 %vm1128_vm0, %v3142_v18  ;;  %2902 = vmatpush3.bf16.msra.mxu1 %v3164_v48  ;;  %v3172_v48 = vld [vmem:[%s4291_s3 + $0xe8] sm:$0xff]  }
 0x1b1   :  { %2903 = vmatprep.subr.bf16.mxu1 %v3168_v33 }
 0x1b7   :  { %3055 = vmatmul.mubr.msk.bf16.gmra.mrb[24].mxu1 %vm1128_vm0, %v3143_v20 }
 0x1b8   :  { %3058 = vmatprep.mubr.msk.bf16.mxu1 %vm1128_vm0, %v3144_v21  ;;  %v3165_v21 = vld [vmem:[%s4291_s3 + $0x30] sm:$0xff]  }
 0x1b9   :  { %2888 = vmatpush3.bf16.msra.mxu0 %v3165_v21 }
 0x1ba   :  { %2889 = vmatprep.subr.bf16.mxu0 %v3166_v26  ;;  %v3174_v26 = vld [vmem:[%s4291_s3 + $0xf0] sm:$0xff]  }
 0x1bd   :  { %2890 = vmatpush3.bf16.msra.mxu0 %v3167_v27 }
 0x1bf   :  { %3059 = vmatmul.mubr.msk.bf16.gmra.mrb[28].mxu1 %vm1128_vm0, %v3145_v23 }
 0x25a   :  { %v3032_v34 = vpop.f32.mrb[0].mxu1 }
 0x25b   :  { %v3984_v35 = vpop.f32.mrb[1].mxu1 }
 0x25c   :  { %v3033_v36 = vpop.f32.mrb[2].mxu1 }
 0x25d   :  { %v1343_v40 = vpack.c.bf16 %v3033_v36, %v3032_v34  ;;  %v3995_v22 = vpop.f32.mrb[3].mxu1  ;;  %v3169_v36 = vld [vmem:[%s4291_s3 + $0x98] sm:$0xff]  }
 0x25e   :  { %v1342_v42 = vpack.c.bf16 %v3995_v22, %v3984_v35  ;;  %2904 = vmatpush3.bf16.msra.mxu1 %v3169_v36  ;;  %v3175_v36 = vld [vmem:[%s4291_s3 + $0xb0] sm:$0xff]  }
 0x25f   :  { %1359 = vrot.lane.b32.xlu0 %v1343_v40, %s3221_s24  ;;  %2905 = vmatprep.subr.bf16.mxu1 %v3170_v38 }
 0x262   :  { %v3036_v45 = vpop.f32.mrb[4].mxu1  ;;  %2906 = vmatpush3.bf16.msra.mxu1 %v3171_v39  ;;  %v3176_v39 = vld [vmem:[%s4291_s3 + $0xf8] sm:$0xff]  }
 0x263   :  { %v1231_v18 = vpop.f32.mrb[5].mxu1  ;;  %2907 = vmatprep.subr.bf16.mxu1 %v3172_v48 }
 0x264   :  { %v3037_v20 = vpop.f32.mrb[6].mxu1 }
 0x265   :  { %v1345_v23 = vpack.c.bf16 %v3037_v20, %v3036_v45  ;;  %v1234_v24 = vpop.f32.mrb[7].mxu1 }
 0x266   :  { %v1344_v25 = vpack.c.bf16 %v1234_v24, %v1231_v18  ;;  %v3173_v18 = vld [vmem:[%s4291_s3 + $0xa8] sm:$0xff]  }
 0x267   :  { %1365 = vrot.lane.b32.xlu0 %v1345_v23, %s3222_s13  ;;  %2908 = vmatpush3.bf16.msra.mxu1 %v3173_v18 }
 0x268   :  { %1362 = vrot.lane.b32.xlu1 %v1344_v25, %s3223_s14  ;;  %2909 = vmatprep.subr.bf16.mxu1 %v3174_v26 }
 0x26a   :  { %v3040_v28 = vpop.f32.mrb[8].mxu1 }
 0x26b   :  { %v4029_v29 = vpop.f32.mrb[9].mxu1  ;;  %2910 = vmatpush3.bf16.msra.mxu1 %v3175_v36 }
 0x26c   :  { %v3041_v30 = vpop.f32.mrb[10].mxu1  ;;  %2911 = vmatprep.subr.bf16.mxu1 %v3176_v39 }
 0x26d   :  { %v1347_v31 = vpack.c.bf16 %v3041_v30, %v3040_v28  ;;  %v4031_v32 = vpop.f32.mrb[11].mxu1 }
 0x26e   :  { %v1346_v34 = vpack.c.bf16 %v4031_v32, %v4029_v29 }
 0x26f   :  { %1368 = vrot.lane.b32.xlu0 %v1347_v31, %s3221_s24 }
 0x272   :  { %v3044_v37 = vpop.f32.mrb[12].mxu1 }
 0x273   :  { %v1263_v40 = vpop.f32.mrb[13].mxu1 }
 0x274   :  { %v3045_v41 = vpop.f32.mrb[14].mxu1 }
 0x275   :  { %v1349_v43 = vpack.c.bf16 %v3045_v41, %v3044_v37  ;;  %v1266_v44 = vpop.f32.mrb[15].mxu1 }
 0x276   :  { %v1348_v45 = vpack.c.bf16 %v1266_v44, %v1263_v40  ;;  %v3177_v40 = vld [vmem:[%s4291_s3 + $0xb8] sm:$0xff]  }
 0x277   :  { %1374 = vrot.lane.b32.xlu0 %v1349_v43, %s3222_s13  ;;  %2912 = vmatpush3.bf16.msra.mxu1 %v3177_v40 }
 0x278   :  { %1371 = vrot.lane.b32.xlu1 %v1348_v45, %s3223_s14 }
 0x27a   :  { %v3048_v46 = vpop.f32.mrb[16].mxu1 }
 0x27b   :  { %v4050_v47 = vpop.f32.mrb[17].mxu1 }
 0x27c   :  { %v3049_v20 = vpop.f32.mrb[18].mxu1 }
 0x27d   :  { %v1351_v21 = vpack.c.bf16 %v3049_v20, %v3048_v46  ;;  %v1282_v23 = vpop.f32.mrb[19].mxu1 }
 0x27e   :  { %v1350_v24 = vpack.c.bf16 %v1282_v23, %v4050_v47 }
 0x27f   :  { %1377 = vrot.lane.b32.xlu1 %v1351_v21, %s3221_s24 }
 0x282   :  { %v3052_v25 = vpop.f32.mrb[20].mxu1 }
 0x283   :  { %v1295_v27 = vpop.f32.mrb[21].mxu1 }
 0x284   :  { %v3053_v28 = vpop.f32.mrb[22].mxu1 }
 0x285   :  { %v1353_v30 = vpack.c.bf16 %v3053_v28, %v3052_v25  ;;  %v1298_v31 = vpop.f32.mrb[23].mxu1 }
 0x286   :  { %v1352_v33 = vpack.c.bf16 %v1298_v31, %v1295_v27 }
 0x288   :  { %1380 = vrot.lane.b32.xlu1 %v1352_v33, %s3223_s14 }
 0x28a   :  { %v3056_v37 = vpop.f32.mrb[24].mxu1 }
 0x28b   :  { %v1311_v38 = vpop.f32.mrb[25].mxu1 }
 0x28c   :  { %v3057_v41 = vpop.f32.mrb[26].mxu1 }
 0x28d   :  { %v1355_v43 = vpack.c.bf16 %v3057_v41, %v3056_v37  ;;  %v1314_v44 = vpop.f32.mrb[27].mxu1 }
 0x28e   :  { %v1354_v45 = vpack.c.bf16 %v1314_v44, %v1311_v38 }
 0x28f   :  { %1386 = vrot.lane.b32.xlu1 %v1355_v43, %s3221_s24 }
 0x292   :  { %v3060_v46 = vpop.f32.mrb[28].mxu1 }
 0x293   :  { %1383 = vrot.lane.b32.xlu1 %v1353_v30, %s3222_s13  ;;  %v1327_v47 = vpop.f32.mrb[29].mxu1 }
 0x294   :  { %v3061_v48 = vpop.f32.mrb[30].mxu1 }
 0x295   :  { %v1357_v18 = vpack.c.bf16 %v3061_v48, %v3060_v46  ;;  %v1330_v20 = vpop.f32.mrb[31].mxu1  ;;  %v3224_v48 = vmov 0.0  }
 0x296   :  { %v1356_v21 = vpack.c.bf16 %v1330_v20, %v1327_v47  ;;  %3062 = vmatprep.subr.bf16.mxu0 %v3224_v48 }
 0x298   :  { %1389 = vrot.lane.b32.xlu0 %v1356_v21, %s3223_s14 }
 0x29c   :  { %1392 = vrot.lane.b32.xlu0 %v1357_v18, %s3222_s13 }
 0x2d1   :  { %v1360_v23 = vpop.permute.xlu0 %1359 }
 0x2d2   :  { %v1397_v28 = vsel %vm1394_vm2, %v1342_v42, %v1360_v23 }
 0x2d9   :  { %v1366_v25 = vpop.permute.xlu0 %1365 }
 0x2da   :  { %v1363_v26 = vpop.permute.xlu1 %1362 }
 0x2db   :  { %v1400_v30 = vsel %vm1398_vm3, %v1397_v28, %v1363_v26 }
 0x2dc   :  { %v1403_v39 = vsel %vm1401_vm4, %v1400_v30, %v1366_v25  ;;  %v695_v25 = vld [vmem:[%s4294_s6 + $0x1] ss:$0 sm:$0xff] }
 0x2e1   :  { %v1369_v27 = vpop.permute.xlu0 %1368 }
 0x2e2   :  { %v1407_v31 = vsel %vm1394_vm2, %v1346_v34, %v1369_v27 }
 0x2e9   :  { %v1375_v36 = vpop.permute.xlu0 %1374 }
 0x2ea   :  { %v1372_v33 = vpop.permute.xlu1 %1371 }
 0x2eb   :  { %v1409_v37 = vsel %vm1398_vm3, %v1407_v31, %v1372_v33 }
 0x2ec   :  { %v1411_v38 = vsel %vm1401_vm4, %v1409_v37, %v1375_v36 }
 0x2ed   :  { %1717 = vmatprep.mubr.bf16.mxu0 %v1411_v38 }
 0x2ee   :  { %1718 = vmatmul.mubr.bf16.vlgmr.msra.gmra.mrb[28].mxu0 %v1403_v39 }
 0x2ef   :  { %3064 = vmatprep.mubr.msk.bf16.mxu0 %vm3225_vm5, %v3224_v48 }
 0x2f1   :  { %v1378_v35 = vpop.permute.xlu1 %1377 }
 0x2f2   :  { %v1415_v29 = vsel %vm1394_vm2, %v1350_v24, %v1378_v35 }
 0x2fa   :  { %v1381_v22 = vpop.permute.xlu1 %1380 }
 0x2fb   :  { %v1417_v44 = vsel %vm1398_vm3, %v1415_v29, %v1381_v22  ;;  %v3181_v29 = vld [vmem:[%s4293_s5 + $0x40] sm:$0xff]  }
 0x2fc   :  { %2923 = vmatprep.subr.bf16.mxu1 %v3181_v29  ;;  %v3211_v29 = vld [vmem:[%s4293_s5 + $0xb0] sm:$0xff]  }
 0x301   :  { %v1387_v42 = vpop.permute.xlu1 %1386 }
 0x302   :  { %v1423_v41 = vsel %vm1394_vm2, %v1354_v45, %v1387_v42 }
 0x305   :  { %v1384_v43 = vpop.permute.xlu1 %1383 }
 0x306   :  { %v1419_v47 = vsel %vm1401_vm4, %v1417_v44, %v1384_v43  ;;  %v3180_v43 = vld [vmem:[%s4292_s4 + $0x10] ss:$0 sps:$4 sm:$0x33]   ;;  %v3187_v44 = vld [vmem:[%s4293_s5 + $0xc0] sm:$0xff]  }
 0x30a   :  { %v1390_v40 = vpop.permute.xlu0 %1389 }
 0x30b   :  { %v1425_v32 = vsel %vm1398_vm3, %v1423_v41, %v1390_v40  ;;  %v3178_v40 = vld [vmem:[%s4292_s4] sm:$0xff]   ;;  %v3179_v41 = vld [vmem:[%s4292_s4 + $0x8] sm:$0xff]  }
 0x30e   :  { %v1393_v34 = vpop.permute.xlu0 %1392 }
 0x30f   :  { %v1427_v46 = vsel %vm1401_vm4, %v1425_v32, %v1393_v34  ;;  %v3182_v32 = vld [vmem:[%s4293_s5] sm:$0xff]   ;;  %v3183_v34 = vld [vmem:[%s4293_s5 + $0x48] sm:$0xff]  }
 0x310   :  { %1758 = vmatprep.mubr.bf16.mxu1 %v1427_v46  ;;  %v3188_v46 = vld [vmem:[%s4293_s5 + $0x80] sm:$0xff]  }
 0x311   :  { %1759 = vmatmul.mubr.bf16.vlgmr.msra.gmra.mrb[32].mxu1 %v1419_v47  ;;  %v3184_v47 = vld [vmem:[%s4293_s5 + $0x8] sm:$0xff]  }
 0x312   :  { %2924 = vmatpush3.bf16.msra.mxu1 %v3182_v32  ;;  %v3212_v32 = vld [vmem:[%s4293_s5 + $0xf8] sm:$0xff]  }
 0x313   :  { %2925 = vmatprep.subr.bf16.mxu1 %v3183_v34 }
 0x316   :  { %2926 = vmatpush3.bf16.msra.mxu1 %v3184_v47 }
 0x3c1   :  { %v2891_v45 = vpop.f32.mrb[28].mxu0 }
 0x3c2   :  { %v2892_v24 = vpop.f32.mrb[29].mxu0 }
 0x3c3   :  { %v2893_v18 = vadd.f32 %v2892_v24, %v2891_v45  ;;  %v2894_v20 = vpop.f32.mrb[30].mxu0  ;;  %v3191_v45 = vld [vmem:[%s4293_s5 + $0xc8] sm:$0xff]   ;;  %v3185_v24 = vld [vmem:[%s4293_s5 + $0x50] sm:$0xff]  }
 0x3c4   :  { %v2895_v21 = vpop.f32.mrb[31].mxu0  ;;  %2927 = vmatprep.subr.bf16.mxu1 %v3185_v24 }
 0x3c5   :  { %v2896_v23 = vadd.f32 %v2895_v21, %v2894_v20  ;;  %v1720_v28 = vadd.f32 %v2893_v18, %v695_v25  ;;  %v3192_v18 = vld [vmem:[%s4293_s5 + $0x88] sm:$0xff]   ;;  %v3195_v20 = vld [vmem:[%s4293_s5 + $0xd0] sm:$0xff]  }
 0x3c6   :  { %v3186_v21 = vld [vmem:[%s4293_s5 + $0x10] sm:$0xff]  }
 0x3c7   :  { %v1723_v36 = vadd.f32 %v2896_v23, %v695_v25  ;;  %v3189_v23 = vld [vmem:[%s4293_s5 + $0x58] sm:$0xff]   ;;  %v3196_v25 = vld [vmem:[%s4293_s5 + $0x90] sm:$0xff]   ;;  %2928 = vmatpush3.bf16.msra.mxu1 %v3186_v21 }
 0x3c8   :  { %2929 = vmatprep.subr.bf16.mxu1 %v3189_v23 }
 0x3e4   :  { %v2913_v26 = vpop.f32.mrb[32].mxu1 }
 0x3e5   :  { %v2914_v27 = vpop.f32.mrb[33].mxu1 }
 0x3e6   :  { %v2915_v30 = vadd.f32 %v2914_v27, %v2913_v26  ;;  %v2916_v31 = vpop.f32.mrb[34].mxu1  ;;  %v3199_v26 = vld [vmem:[%s4293_s5 + $0xd8] sm:$0xff]  }
 0x3e7   :  { %v2917_v33 = vpop.f32.mrb[35].mxu1  ;;  %v3190_v27 = vld [vmem:[%s4293_s5 + $0x18] sm:$0xff]  }
 0x3e8   :  { %v1761_v37 = vadd.f32 %v2915_v30, %v1720_v28  ;;  %v2918_v38 = vadd.f32 %v2917_v33, %v2916_v31  ;;  %v3193_v28 = vld [vmem:[%s4293_s5 + $0x60] sm:$0xff]   ;;  %v3200_v30 = vld [vmem:[%s4293_s5 + $0x98] sm:$0xff]   ;;  %2930 = vmatpush3.bf16.msra.mxu1 %v3190_v27 }
 0x3e9   :  { %v3203_v31 = vld [vmem:[%s4293_s5 + $0xe0] sm:$0xff]   ;;  %2931 = vmatprep.subr.bf16.mxu1 %v3193_v28 }
 0x3ea   :  { %v1764_v39 = vadd.f32 %v2918_v38, %v1723_v36  ;;  %v1767_v35 = vmax.f32 %v1761_v37, 0.0  ;;  %v3194_v33 = vld [vmem:[%s4293_s5 + $0x20] sm:$0xff]   ;;  %v3197_v36 = vld [vmem:[%s4293_s5 + $0x68] sm:$0xff]  }
 0x3eb   :  { %v3204_v37 = vld [vmem:[%s4293_s5 + $0xa0] sm:$0xff]   ;;  %v3207_v38 = vld [vmem:[%s4293_s5 + $0xe8] sm:$0xff]  }
 0x3ec   :  { %v1768_v22 = vmax.f32 %v1764_v39, 0.0  ;;  %2932 = vmatpush3.bf16.msra.mxu1 %v3194_v33  ;;  %v3198_v39 = vld [vmem:[%s4293_s5 + $0x28] sm:$0xff]  }
 0x3ed   :  { %2933 = vmatprep.subr.bf16.mxu1 %v3197_v36 }
 0x3ee   :  { %v1769_v42 = vpack.c.bf16 %v1768_v22, %v1767_v35  ;;  %v3201_v35 = vld [vmem:[%s4293_s5 + $0x70] sm:$0xff]   ;;  %v3208_v22 = vld [vmem:[%s4293_s5 + $0xa8] sm:$0xff]  }
 0x3f0   :  { %3063 = vmatpush3.bf16.msra.mxu0 %v1769_v42  ;;  %2934 = vmatpush3.bf16.msra.mxu1 %v3198_v39  ;;  %v3202_v42 = vld [vmem:[%s4293_s5 + $0x30] sm:$0xff]  }
 0x3f1   :  { %2945 = vmatprep.subr.bf16.mxu0 %v3187_v44  ;;  %2935 = vmatprep.subr.bf16.mxu1 %v3201_v35  ;;  %v3214_v44 = vld [vmem:[%s4293_s5 + $0xb8] sm:$0xff]  }
 0x3f3   :  { %3065 = vmatmul.mubr.msk.bf16.vlgmr.msra.gmra.mrb[32].mxu0 %vm1788_vm6, %v3178_v40  ;;  %v3205_v40 = vld [vmem:[%s4293_s5 + $0x78] sm:$0xff]  }
 0x3f4   :  { %3068 = vmatprep.mubr.msk.bf16.mxu0 %vm3225_vm5, %v3224_v48  ;;  %2946 = vmatpush3.bf16.msra.mxu0 %v3188_v46 }
 0x3f5   :  { %2947 = vmatprep.subr.bf16.mxu0 %v3191_v45  ;;  %2936 = vmatpush3.bf16.msra.mxu1 %v3202_v42 }
 0x3f6   :  { %2937 = vmatprep.subr.bf16.mxu1 %v3205_v40 }
 0x3f8   :  { %2948 = vmatpush3.bf16.msra.mxu0 %v3192_v18 }
 0x3f9   :  { %2949 = vmatprep.subr.bf16.mxu0 %v3195_v20 }
 0x3fb   :  { %3069 = vmatmul.mubr.msk.bf16.gmra.mrb[36].mxu0 %vm1788_vm6, %v3179_v41  ;;  %v3206_v41 = vld [vmem:[%s4293_s5 + $0x38] sm:$0xff]  }
 0x3fc   :  { %3072 = vmatprep.mubr.msk.bf16.mxu0 %vm3225_vm5, %v3224_v48  ;;  %2950 = vmatpush3.bf16.msra.mxu0 %v3196_v25 }
 0x3fd   :  { %2951 = vmatprep.subr.bf16.mxu0 %v3199_v26  ;;  %2938 = vmatpush3.bf16.msra.mxu1 %v3206_v41  ;;  %v3213_v41 = vld [vmem:[%s4293_s5 + $0x108] sm:$0xff]  }
 0x3fe   :  { %3076 = vmatprep.subr.bf16.mxu1 %v3224_v48 }
 0x400   :  { %2952 = vmatpush3.bf16.msra.mxu0 %v3200_v30 }
 0x401   :  { %2953 = vmatprep.subr.bf16.mxu0 %v3203_v31 }
 0x403   :  { %3073 = vmatmul.mubr.msk.bf16.gmra.mrb[40].mxu0 %vm1788_vm6, %v3180_v43  ;;  %v3209_v43 = vld [vmem:[%s4293_s5 + $0xf0] sm:$0xff]  }
 0x404   :  { %2954 = vmatpush3.bf16.msra.mxu0 %v3204_v37 }
 0x405   :  { %2955 = vmatprep.subr.bf16.mxu0 %v3207_v38 }
 0x408   :  { %2956 = vmatpush3.bf16.msra.mxu0 %v3208_v22  ;;  %v3210_v22 = vld [vmem:[%s4293_s5 + $0x100] sm:$0xff]  }
 0x409   :  { %2957 = vmatprep.subr.bf16.mxu0 %v3209_v43 }
 0x40c   :  { %2958 = vmatpush3.bf16.msra.mxu0 %v3211_v29 }
 0x40d   :  { %2959 = vmatprep.subr.bf16.mxu0 %v3212_v32 }
 0x410   :  { %2960 = vmatpush3.bf16.msra.mxu0 %v3214_v44 }
 0x4c6   :  { %v1832_v34 = vpop.f32.mrb[32].mxu0 }
 0x4c7   :  { %v3066_v46 = vpop.f32.mrb[33].mxu0 }
 0x4c8   :  { %v1835_v47 = vpop.f32.mrb[34].mxu0 }
 0x4c9   :  { %v1854_v45 = vpack.c.bf16 %v1835_v47, %v1832_v34  ;;  %v3067_v24 = vpop.f32.mrb[35].mxu0  ;;  %v3215_v34 = vld [vmem:[%s4293_s5 + $0x110] sm:$0xff]   ;;  %v3216_v47 = vld [vmem:[%s4293_s5 + $0x118] sm:$0xff]  }
 0x4cb   :  { %v1862_v18 = vrot.slane %v1854_v45, 6  ;;  %v1858_v20 = vrot.slane %v1854_v45, 2  ;;  %v1861_v38 = vrot.slane %v1854_v45, 4 }
 0x4cd   :  { %1863 = vrot.lane.b32.xlu0 %v1862_v18, %s3223_s14  ;;  %1859 = vrot.lane.b32.xlu1 %v1858_v20, %s3223_s14 }
 0x4ce   :  { %v1840_v21 = vpop.f32.mrb[36].mxu0 }
 0x4cf   :  { %v3070_v23 = vpop.f32.mrb[37].mxu0 }
 0x4d0   :  { %v1843_v25 = vpop.f32.mrb[38].mxu0 }
 0x4d1   :  { %v1855_v26 = vpack.c.bf16 %v1843_v25, %v1840_v21  ;;  %v3071_v27 = vpop.f32.mrb[39].mxu0  ;;  %v696_v25 = vld [vmem:[%s4294_s6 + $0x2] ss:$0 sm:$0xff] }
 0x4d3   :  { %v1870_v28 = vrot.slane %v1855_v26, 6  ;;  %v1866_v30 = vrot.slane %v1855_v26, 2  ;;  %v1869_v43 = vrot.slane %v1855_v26, 4 }
 0x4d5   :  { %1871 = vrot.lane.b32.xlu0 %v1870_v28, %s3223_s14  ;;  %1867 = vrot.lane.b32.xlu1 %v1866_v30, %s3223_s14 }
 0x4d6   :  { %v1848_v31 = vpop.f32.mrb[40].mxu0 }
 0x4d7   :  { %v3074_v33 = vpop.f32.mrb[41].mxu0 }
 0x4d8   :  { %v1851_v36 = vpop.f32.mrb[42].mxu0 }
 0x4d9   :  { %v3075_v37 = vpop.f32.mrb[43].mxu0 }
 0x53f   :  { %v1864_v39 = vpop.permute.xlu0 %1863  ;;  %v1860_v35 = vpop.permute.xlu1 %1859 }
 0x540   :  { %v1875_v42 = vsel %vm1398_vm3, %v1854_v45, %v1860_v35  ;;  %v1879_v40 = vsel %vm1398_vm3, %v1861_v38, %v1864_v39  ;;  %v1856_v45 = vpack.c.bf16 %v1848_v31, %v1848_v31 }
 0x541   :  { %2212 = vmatprep.mubr.bf16.mxu1 %v1879_v40 }
 0x542   :  { %2213 = vmatmul.mubr.bf16.vlgmr.msra.gmra.mrb[36].mxu1 %v1875_v42 }
 0x543   :  { %3077 = vmatpush3.bf16.msra.mxu1 %v3210_v22  ;;  %3084 = vmatprep.mubr.msk.bf16.mxu1 %vm3225_vm5, %v3224_v48 }
 0x544   :  { %3078 = vmatprep.subr.bf16.mxu1 %v3224_v48 }
 0x547   :  { %3079 = vmatpush3.bf16.msra.mxu1 %v3213_v41  ;;  %v1872_v29 = vpop.permute.xlu0 %1871  ;;  %v1868_v32 = vpop.permute.xlu1 %1867 }
 0x548   :  { %v1883_v44 = vsel %vm1398_vm3, %v1855_v26, %v1868_v32  ;;  %v1887_v46 = vsel %vm1398_vm3, %v1869_v43, %v1872_v29  ;;  %3080 = vmatprep.subr.bf16.mxu1 %v3224_v48 }
 0x549   :  { %2252 = vmatprep.mubr.bf16.mxu0 %v1887_v46 }
 0x54a   :  { %2253 = vmatmul.mubr.bf16.vlgmr.msra.gmra.mrb[44].mxu0 %v1883_v44 }
 0x54b   :  { %3081 = vmatpush3.bf16.msra.mxu1 %v3215_v34 }
 0x54c   :  { %3082 = vmatprep.subr.bf16.mxu1 %v3224_v48 }
 0x54f   :  { %3083 = vmatpush3.bf16.msra.mxu1 %v3216_v47 }
 0x552   :  { %3085 = vmatmul.mubr.msk.bf16.vlgmr.msra.gmra.mrb[40].mxu1 %vm1398_vm3, %v1856_v45 }
 0x615   :  { %v2939_v24 = vpop.f32.mrb[36].mxu1 }
 0x616   :  { %v2940_v18 = vpop.f32.mrb[37].mxu1 }
 0x617   :  { %v2941_v20 = vadd.f32 %v2940_v18, %v2939_v24  ;;  %v2942_v21 = vpop.f32.mrb[38].mxu1 }
 0x618   :  { %v2943_v23 = vpop.f32.mrb[39].mxu1 }
 0x619   :  { %v2215_v28 = vadd.f32 %v2941_v20, %v696_v25 }
 0x61d   :  { %v2961_v26 = vpop.f32.mrb[44].mxu0 }
 0x61e   :  { %v2962_v27 = vpop.f32.mrb[45].mxu0 }
 0x61f   :  { %v2963_v30 = vadd.f32 %v2962_v27, %v2961_v26  ;;  %v2964_v33 = vpop.f32.mrb[46].mxu0 }
 0x620   :  { %v2965_v36 = vpop.f32.mrb[47].mxu0 }
 0x621   :  { %v2255_v48 = vadd.f32 %v2963_v30, %v2215_v28 }
 0x625   :  { %v2294_v31 = vpop.f32.mrb[40].mxu1 }
 0x626   :  { %v2295_v37 = vadd.f32 %v2294_v31, %v2255_v48  ;;  %v3086_v38 = vpop.f32.mrb[41].mxu1 }
 0x627   :  { %v2297_v39 = vpop.f32.mrb[42].mxu1 }
 0x628   :  { %v2300_v35 = vmax.f32 %v2295_v37, 0.0  ;;  %v3087_v22 = vpop.f32.mrb[43].mxu1 }
 0x62a   :  { %v2301_v42 = vpack.c.bf16 %v2300_v35, %v2300_v35 }
 0x62c   :  { %v2303_v40 = vshrl.u32 %v2301_v42, 16  ;;  %v2308_v29 = vrot.slane %v2301_v42, 1 }
 0x62e   :  { %2305 = vrot.lane.b32.xlu0 %v2303_v40, %s3223_s14  ;;  %v2309_v41 = vrot.slane %v2303_v40, 1 }
 0x630   :  { %2310 = vrot.lane.b32.xlu1 %v2309_v41, %s3223_s14 }
 0x6a0   :  { %v2306_v43 = vpop.permute.xlu0 %2305 }
 0x6a1   :  { %v4243_v32 = vsel %vm1398_vm3, %v2301_v42, %v2306_v43 }
 0x6a2   :  { %v2311_v34 = vpop.permute.xlu1 %2310 }
 0x6a3   :  { %v2317_v44 = vsel %vm1398_vm3, %v2308_v29, %v2311_v34 }
 0x6a4   :  { %3217 = dma.done.wait [#allocation4], 8192 }
 0x6a5   :  { %3218 = vsyncadd [#allocation4], 4294959104  ;;  %2440 = vmatprep.mubr.bf16.mxu0 %v2317_v44  ;;  %2481 = vmatprep.mubr.bf16.mxu1 %v2317_v44  ;;  %v2324_v46 = vld [vmem:[#allocation2 + $0x8] sm:$0xff]  ;;  %v2326_v47 = vld [vmem:[#allocation2 + $0x18] sm:$0xff] }
 0x6a6   :  { %v2323_v45 = vld [vmem:[#allocation2] sm:$0xff]  ;;  %2408 = vmatprep.subr.bf16.mxu0 %v2324_v46  ;;  %2449 = vmatprep.subr.bf16.mxu1 %v2326_v47  ;;  %v2325_v24 = vld [vmem:[#allocation2 + $0x10] sm:$0xff]  ;;  %v2328_v18 = vld [vmem:[#allocation2 + $0x28] sm:$0xff] }
 0x6a7   :  { %v2330_v20 = vld [vmem:[#allocation2 + $0x38] sm:$0xff]  ;;  %2409 = vmatpush1.bf16.msra.mxu0 %v2323_v45  ;;  %2450 = vmatpush1.bf16.msra.mxu1 %v2325_v24  ;;  %v2327_v21 = vld [vmem:[#allocation2 + $0x20] sm:$0xff]  ;;  %v2329_v23 = vld [vmem:[#allocation2 + $0x30] sm:$0xff] }
 0x6a8   :  { %2410 = vmatprep.subr.bf16.mxu0 %v2328_v18  ;;  %2451 = vmatprep.subr.bf16.mxu1 %v2330_v20  ;;  %v2332_v25 = vld [vmem:[#allocation2 + $0x48] sm:$0xff]  ;;  %v2334_v26 = vld [vmem:[#allocation2 + $0x58] sm:$0xff]  ;;  %v2331_v27 = vld [vmem:[#allocation2 + $0x40] sm:$0xff] }
 0x6a9   :  { %v2333_v28 = vld [vmem:[#allocation2 + $0x50] sm:$0xff]  ;;  %v2336_v30 = vld [vmem:[#allocation2 + $0x68] sm:$0xff]  ;;  %v2338_v33 = vld [vmem:[#allocation2 + $0x78] sm:$0xff] }
 0x6aa   :  { %v2335_v36 = vld [vmem:[#allocation2 + $0x60] sm:$0xff]  ;;  %v2337_v48 = vld [vmem:[#allocation2 + $0x70] sm:$0xff]  ;;  %v2340_v31 = vld [vmem:[#allocation2 + $0x88] sm:$0xff] }
 0x6ab   :  { %2411 = vmatpush1.bf16.msra.mxu0 %v2327_v21  ;;  %2452 = vmatpush1.bf16.msra.mxu1 %v2329_v23  ;;  %v2342_v37 = vld [vmem:[#allocation2 + $0x98] sm:$0xff]  ;;  %v2339_v38 = vld [vmem:[#allocation2 + $0x80] sm:$0xff]  ;;  %v2341_v39 = vld [vmem:[#allocation2 + $0x90] sm:$0xff] }
 0x6ac   :  { %2412 = vmatprep.subr.bf16.mxu0 %v2332_v25  ;;  %2453 = vmatprep.subr.bf16.mxu1 %v2334_v26  ;;  %v2344_v35 = vld [vmem:[#allocation2 + $0xa8] sm:$0xff]  ;;  %v2346_v22 = vld [vmem:[#allocation2 + $0xb8] sm:$0xff]  ;;  %v2343_v42 = vld [vmem:[#allocation2 + $0xa0] sm:$0xff] }
 0x6ad   :  { %v2345_v40 = vld [vmem:[#allocation2 + $0xb0] sm:$0xff]  ;;  %v2348_v41 = vld [vmem:[#allocation2 + $0xc8] sm:$0xff]  ;;  %v2350_v43 = vld [vmem:[#allocation2 + $0xd8] sm:$0xff] }
 0x6ae   :  { %v2347_v29 = vld [vmem:[#allocation2 + $0xc0] sm:$0xff]  ;;  %v2349_v34 = vld [vmem:[#allocation2 + $0xd0] sm:$0xff]  ;;  %v2352_v44 = vld [vmem:[#allocation2 + $0xe8] sm:$0xff] }
 0x6af   :  { %2413 = vmatpush1.bf16.msra.mxu0 %v2331_v27  ;;  %2454 = vmatpush1.bf16.msra.mxu1 %v2333_v28  ;;  %v2354_v46 = vld [vmem:[#allocation2 + $0xf8] sm:$0xff]  ;;  %v2351_v47 = vld [vmem:[#allocation2 + $0xe0] sm:$0xff]  ;;  %v2353_v45 = vld [vmem:[#allocation2 + $0xf0] sm:$0xff] }
 0x6b0   :  { %2414 = vmatprep.subr.bf16.mxu0 %v2336_v30  ;;  %2455 = vmatprep.subr.bf16.mxu1 %v2338_v33  ;;  %v2356_v24 = vld [vmem:[#allocation2 + $0x108] sm:$0xff]  ;;  %v2358_v18 = vld [vmem:[#allocation2 + $0x118] sm:$0xff]  ;;  %v2355_v20 = vld [vmem:[#allocation2 + $0x100] sm:$0xff] }
 0x6b1   :  { %v2357_v21 = vld [vmem:[#allocation2 + $0x110] sm:$0xff]  ;;  %v2360_v23 = vld [vmem:[#allocation2 + $0x128] sm:$0xff]  ;;  %v2362_v25 = vld [vmem:[#allocation2 + $0x138] sm:$0xff] }
 0x6b2   :  { %v2359_v26 = vld [vmem:[#allocation2 + $0x120] sm:$0xff]  ;;  %v2361_v27 = vld [vmem:[#allocation2 + $0x130] sm:$0xff]  ;;  %v2364_v28 = vld [vmem:[#allocation2 + $0x148] sm:$0xff] }
 0x6b3   :  { %2415 = vmatpush1.bf16.msra.mxu0 %v2335_v36  ;;  %2456 = vmatpush1.bf16.msra.mxu1 %v2337_v48  ;;  %v2366_v30 = vld [vmem:[#allocation2 + $0x158] sm:$0xff]  ;;  %v2363_v33 = vld [vmem:[#allocation2 + $0x140] sm:$0xff]  ;;  %v2365_v36 = vld [vmem:[#allocation2 + $0x150] sm:$0xff] }
 0x6b4   :  { %2416 = vmatprep.subr.bf16.mxu0 %v2340_v31  ;;  %2457 = vmatprep.subr.bf16.mxu1 %v2342_v37  ;;  %v2368_v48 = vld [vmem:[#allocation2 + $0x168] sm:$0xff]  ;;  %v2370_v31 = vld [vmem:[#allocation2 + $0x178] sm:$0xff]  ;;  %v2367_v37 = vld [vmem:[#allocation2 + $0x160] sm:$0xff] }
 0x6b7   :  { %2417 = vmatpush1.bf16.msra.mxu0 %v2339_v38  ;;  %2458 = vmatpush1.bf16.msra.mxu1 %v2341_v39  ;;  %v2369_v38 = vld [vmem:[#allocation2 + $0x170] sm:$0xff]  ;;  %v2372_v39 = vld [vmem:[#allocation2 + $0x188] sm:$0xff] }
 0x6b8   :  { %2418 = vmatprep.subr.bf16.mxu0 %v2344_v35  ;;  %2459 = vmatprep.subr.bf16.mxu1 %v2346_v22  ;;  %v2374_v35 = vld [vmem:[#allocation2 + $0x198] sm:$0xff]  ;;  %v2371_v22 = vld [vmem:[#allocation2 + $0x180] sm:$0xff] }
 0x6bb   :  { %2419 = vmatpush1.bf16.msra.mxu0 %v2343_v42  ;;  %2460 = vmatpush1.bf16.msra.mxu1 %v2345_v40  ;;  %v2373_v42 = vld [vmem:[#allocation2 + $0x190] sm:$0xff]  ;;  %v2376_v40 = vld [vmem:[#allocation2 + $0x1a8] sm:$0xff] }
 0x6bc   :  { %2420 = vmatprep.subr.bf16.mxu0 %v2348_v41  ;;  %2461 = vmatprep.subr.bf16.mxu1 %v2350_v43  ;;  %v2378_v41 = vld [vmem:[#allocation2 + $0x1b8] sm:$0xff]  ;;  %v2375_v43 = vld [vmem:[#allocation2 + $0x1a0] sm:$0xff] }
 0x6bf   :  { %2421 = vmatpush1.bf16.msra.mxu0 %v2347_v29  ;;  %2462 = vmatpush1.bf16.msra.mxu1 %v2349_v34  ;;  %v2377_v29 = vld [vmem:[#allocation2 + $0x1b0] sm:$0xff]  ;;  %v2380_v34 = vld [vmem:[#allocation2 + $0x1c8] sm:$0xff] }
 0x6c0   :  { %2422 = vmatprep.subr.bf16.mxu0 %v2352_v44  ;;  %2463 = vmatprep.subr.bf16.mxu1 %v2354_v46  ;;  %v2382_v44 = vld [vmem:[#allocation2 + $0x1d8] sm:$0xff]  ;;  %v2379_v46 = vld [vmem:[#allocation2 + $0x1c0] sm:$0xff] }
 0x6c3   :  { %2423 = vmatpush1.bf16.msra.mxu0 %v2351_v47  ;;  %2464 = vmatpush1.bf16.msra.mxu1 %v2353_v45  ;;  %v2381_v47 = vld [vmem:[#allocation2 + $0x1d0] sm:$0xff]  ;;  %v2384_v45 = vld [vmem:[#allocation2 + $0x1e8] sm:$0xff] }
 0x6c4   :  { %2424 = vmatprep.subr.bf16.mxu0 %v2356_v24  ;;  %2465 = vmatprep.subr.bf16.mxu1 %v2358_v18  ;;  %v2386_v24 = vld [vmem:[#allocation2 + $0x1f8] sm:$0xff]  ;;  %v2383_v18 = vld [vmem:[#allocation2 + $0x1e0] sm:$0xff] }
 0x6c7   :  { %2425 = vmatpush1.bf16.msra.mxu0 %v2355_v20  ;;  %2466 = vmatpush1.bf16.msra.mxu1 %v2357_v21  ;;  %v2385_v20 = vld [vmem:[#allocation2 + $0x1f0] sm:$0xff]  ;;  %v2388_v21 = vlaneseq }
 0x6c8   :  { %2426 = vmatprep.subr.bf16.mxu0 %v2360_v23  ;;  %2467 = vmatprep.subr.bf16.mxu1 %v2362_v25 }
 0x6c9   :  { %v2389_v23 = vshrl.u32 %v2388_v21, 7 }
 0x6cb   :  { %2427 = vmatpush1.bf16.msra.mxu0 %v2359_v26  ;;  %2468 = vmatpush1.bf16.msra.mxu1 %v2361_v27  ;;  %v2390_v25 = vsub.s32 0, %v2389_v23  ;;  %v2398_v26 = vsub.s32 2, %v2389_v23  ;;  %v2394_v27 = vsub.s32 1, %v2389_v23 }
 0x6cc   :  { %2428 = vmatprep.subr.bf16.mxu0 %v2364_v28  ;;  %2469 = vmatprep.subr.bf16.mxu1 %v2366_v30  ;;  %v2402_v28 = vsub.s32 3, %v2389_v23 }
 0x6cd   :  { %v2391_v30 = vrot.slane %v3778_v17, %v2390_v25 }
 0x6cf   :  { %2429 = vmatpush1.bf16.msra.mxu0 %v2363_v33  ;;  %2470 = vmatpush1.bf16.msra.mxu1 %v2365_v36  ;;  %v2399_v33 = vrot.slane %v3778_v17, %v2398_v26  ;;  %v2395_v36 = vrot.slane %v3778_v17, %v2394_v27 }
 0x6d0   :  { %2430 = vmatprep.subr.bf16.mxu0 %v2368_v48  ;;  %2471 = vmatprep.subr.bf16.mxu1 %v2370_v31  ;;  %v2403_v48 = vrot.slane %v3778_v17, %v2402_v28 }
 0x6d3   :  { %2431 = vmatpush1.bf16.msra.mxu0 %v2367_v37  ;;  %2472 = vmatpush1.bf16.msra.mxu1 %v2369_v38 }
 0x6d4   :  { %2432 = vmatprep.subr.bf16.mxu0 %v2372_v39  ;;  %2473 = vmatprep.subr.bf16.mxu1 %v2374_v35 }
 0x6d7   :  { %2433 = vmatpush1.bf16.msra.mxu0 %v2371_v22  ;;  %2474 = vmatpush1.bf16.msra.mxu1 %v2373_v42 }
 0x6d8   :  { %2434 = vmatprep.subr.bf16.mxu0 %v2376_v40  ;;  %2475 = vmatprep.subr.bf16.mxu1 %v2378_v41 }
 0x6db   :  { %2435 = vmatpush1.bf16.msra.mxu0 %v2375_v43  ;;  %2476 = vmatpush1.bf16.msra.mxu1 %v2377_v29 }
 0x6dc   :  { %2436 = vmatprep.subr.bf16.mxu0 %v2380_v34  ;;  %2477 = vmatprep.subr.bf16.mxu1 %v2382_v44 }
 0x6df   :  { %2437 = vmatpush1.bf16.msra.mxu0 %v2379_v46  ;;  %2478 = vmatpush1.bf16.msra.mxu1 %v2381_v47 }
 0x6e0   :  { %2438 = vmatprep.subr.bf16.mxu0 %v2384_v45  ;;  %2479 = vmatprep.subr.bf16.mxu1 %v2386_v24 }
 0x6e3   :  { %2439 = vmatpush1.bf16.msra.mxu0 %v2383_v18  ;;  %2480 = vmatpush1.bf16.msra.mxu1 %v2385_v20 }
 0x6e4   :  { %2972 = vmatprep.subr.bf16.mxu0 %v3658_v57  ;;  %2994 = vmatprep.subr.bf16.mxu1 %v3738_v9 }
 0x6e6   :  { %2441 = vmatmul.mubr.bf16.vlgmr.msra.gmra.mrb[48].mxu0 %v4243_v32  ;;  %2482 = vmatmul.mubr.bf16.vlgmr.msra.gmra.mrb[44].mxu1 %v4243_v32 }
 0x7b9   :  { %v2442_v31 = vpop.f32.mrb[48].mxu0  ;;  %v2483_v37 = vpop.f32.mrb[44].mxu1 }
 0x7ba   :  { %v2443_v38 = vadd.f32 %v2442_v31, %v2391_v30  ;;  %v2484_v39 = vadd.f32 %v2483_v37, %v2399_v33  ;;  %v2444_v35 = vpop.f32.mrb[49].mxu0  ;;  %v2485_v32 = vpop.f32.mrb[45].mxu1 }
 0x7bb   :  { %v2445_v22 = vadd.f32 %v2444_v35, %v2395_v36  ;;  %v2486_v42 = vadd.f32 %v2485_v32, %v2403_v48  ;;  %v2446_v40 = vpop.f32.mrb[50].mxu0  ;;  %v2487_v41 = vpop.f32.mrb[46].mxu1 }
 0x7bc   :  { %v2490_v43 = vmax.f32 %v2443_v38, 0.0  ;;  %v2492_v29 = vmax.f32 %v2484_v39, 0.0  ;;  %v2447_v34 = vpop.f32.mrb[51].mxu0  ;;  %v2488_v44 = vpop.f32.mrb[47].mxu1 }
 0x7bd   :  { %v2491_v46 = vmax.f32 %v2445_v22, 0.0  ;;  %v2493_v47 = vmax.f32 %v2486_v42, 0.0 }
 0x7be   :  { %v2494_v45 = vpack.c.bf16 %v2490_v43, %v2490_v43  ;;  %v2496_v24 = vpack.c.bf16 %v2492_v29, %v2492_v29 }
 0x7bf   :  { %v2495_v18 = vpack.c.bf16 %v2491_v46, %v2491_v46  ;;  %v2497_v17 = vpack.c.bf16 %v2493_v47, %v2493_v47 }
 0x7c0   :  { %3219 = dma.done.wait [#allocation4 + $0x1], 4096 }
 0x7c1   :  { %3220 = vsyncadd [#allocation4 + $0x1], 4294963200  ;;  %2973 = vmatpush3.bf16.msra.mxu0 %v3618_v49  ;;  %2995 = vmatpush3.bf16.msra.mxu1 %v3698_v1 }
 0x7c2   :  { %2974 = vmatprep.subr.bf16.mxu0 %v3663_v58  ;;  %2996 = vmatprep.subr.bf16.mxu1 %v3743_v10 }
 0x7c3   :  { %2566 = vmatprep.mubr.bf16.mxu0 %v2495_v18  ;;  %2606 = vmatprep.mubr.bf16.mxu1 %v2497_v17 }
 0x7c5   :  { %2975 = vmatpush3.bf16.msra.mxu0 %v3623_v50  ;;  %2997 = vmatpush3.bf16.msra.mxu1 %v3703_v2 }
 0x7c6   :  { %2976 = vmatprep.subr.bf16.mxu0 %v3668_v59  ;;  %2998 = vmatprep.subr.bf16.mxu1 %v3748_v11 }
 0x7c9   :  { %2977 = vmatpush3.bf16.msra.mxu0 %v3628_v51  ;;  %2999 = vmatpush3.bf16.msra.mxu1 %v3708_v3 }
 0x7ca   :  { %2978 = vmatprep.subr.bf16.mxu0 %v3673_v60  ;;  %3000 = vmatprep.subr.bf16.mxu1 %v3753_v12 }
 0x7cd   :  { %2979 = vmatpush3.bf16.msra.mxu0 %v3633_v52  ;;  %3001 = vmatpush3.bf16.msra.mxu1 %v3713_v4 }
 0x7ce   :  { %2980 = vmatprep.subr.bf16.mxu0 %v3678_v61  ;;  %3002 = vmatprep.subr.bf16.mxu1 %v3758_v13 }
 0x7d1   :  { %2981 = vmatpush3.bf16.msra.mxu0 %v3638_v53  ;;  %3003 = vmatpush3.bf16.msra.mxu1 %v3718_v5 }
 0x7d2   :  { %2982 = vmatprep.subr.bf16.mxu0 %v3683_v62  ;;  %3004 = vmatprep.subr.bf16.mxu1 %v3763_v14 }
 0x7d5   :  { %2983 = vmatpush3.bf16.msra.mxu0 %v3643_v54  ;;  %3005 = vmatpush3.bf16.msra.mxu1 %v3723_v6 }
 0x7d6   :  { %2984 = vmatprep.subr.bf16.mxu0 %v3688_v63  ;;  %3006 = vmatprep.subr.bf16.mxu1 %v3768_v15 }
 0x7d9   :  { %2985 = vmatpush3.bf16.msra.mxu0 %v3648_v55  ;;  %3007 = vmatpush3.bf16.msra.mxu1 %v3728_v7 }
 0x7da   :  { %2986 = vmatprep.subr.bf16.mxu0 %v3693_v0  ;;  %3008 = vmatprep.subr.bf16.mxu1 %v3773_v16 }
 0x7dd   :  { %2987 = vmatpush3.bf16.msra.mxu0 %v3653_v56  ;;  %3009 = vmatpush3.bf16.msra.mxu1 %v3733_v8 }
 0x7e0   :  { %2567 = vmatmul.mubr.bf16.vlgmr.msra.gmra.mrb[52].mxu0 %v2494_v45  ;;  %2607 = vmatmul.mubr.bf16.vlgmr.msra.gmra.mrb[48].mxu1 %v2496_v24 }
 0x8b3   :  { %v2988_v49 = vpop.f32.mrb[52].mxu0  ;;  %v3010_v50 = vpop.f32.mrb[48].mxu1 }
 0x8b4   :  { %v2989_v51 = vpop.f32.mrb[53].mxu0  ;;  %v3011_v52 = vpop.f32.mrb[49].mxu1 }
 0x8b5   :  { %v2990_v53 = vadd.f32 %v2989_v51, %v2988_v49  ;;  %v3012_v54 = vadd.f32 %v3011_v52, %v3010_v50  ;;  %v2991_v57 = vpop.f32.mrb[54].mxu0  ;;  %v3013_v55 = vpop.f32.mrb[50].mxu1 }
 0x8b6   :  { %v2992_v58 = vpop.f32.mrb[55].mxu0  ;;  %v3014_v59 = vpop.f32.mrb[51].mxu1 }
 0x8b7   :  { %v2569_v60 = vadd.f32 %v2990_v53, %v3786_v19 }
 0x8b9   :  { %v2609_v61 = vadd.f32 %v3012_v54, %v2569_v60 }
 0x8bb   :  { %2614 = vst [vmem:[%s4297_s9] sm:$0x1] %v2609_v61 }
 0x8bc   :  { %2619 = vsyncmov [#allocation4] }
 0x8bf   :  { %s2620_s14 = vpop.sfrf %2619 }
 0x8c0   :  { %p2792_p0 = scmp.ne.s32.totalorder %s2620_s14, 0 }
 0x8c2   :  { %2624 = shalt.err (%p2792_p0)  }
 0x8c3   :  { %2626 = vsyncmov [#allocation4 + $0x1] }
 0x8c6   :  { %s2627_s24 = vpop.sfrf %2626 }
 0x8c7   :  { %p2793_p1 = scmp.ne.s32.totalorder %s2627_s24, 0 }
 0x8c9   :  { %2631 = shalt.err (%p2793_p1)  }

</bundles_post_ra>
